<compile_context>
chip_gen: v6e
topology: v6e:2x2x1
jax: 0.10.0
libtpu: 0.0.40
codegen_flags: <defaults>
</compile_context>

<pallas_src>
import functools

import jax
import jax.numpy as jnp
from jax import lax
from jax.experimental import pallas as pl
from jax.experimental.pallas import tpu as pltpu

_VMEM_LIMIT = 48 * 1024 * 1024  # < v7x 64 MiB physical, > all scoped defaults


def _round_up(x, m):
    return (x + m - 1) // m * m


def _sigmoid1(v):
    """Sigmoid via tanh: one EUP op instead of exp + reciprocal."""
    return 0.5 * jnp.tanh(0.5 * v) + 0.5


# ----------------------------------------------------------------------------
# Pallas kernels
# ----------------------------------------------------------------------------
def _stem_gap_proj_kernel(x_ref, ws_ref, bs_ref, wp_ref, bp_ref, o_ref, acc_ref,
                          *, true_p, inv_p, tile_p):
    """Fused conv-stem matmul + SiLU + global-average-pool + proj + SiLU.

    Grid = (B, P_tiles).  x_ref block: (1, TILE_P, K).  Accumulates per-image
    partial sums of the SiLU'd stem activation in an (8, C0) f32 scratch
    (cross-sublane reduce deferred to the last step), masks padded patch rows,
    and at the last P step applies the mean + projection + SiLU -> (1, 1, F).
    """
    p = pl.program_id(1)

    @pl.when(p == 0)
    def _():
        acc_ref[...] = jnp.zeros_like(acc_ref)

    # (TILE_P, K) bf16 @ (K, C0) bf16 -> f32 accumulate on the MXU.
    s = jnp.dot(x_ref[0], ws_ref[...], preferred_element_type=jnp.float32)
    s = s + bs_ref[...]                       # bias, f32
    s = s * _sigmoid1(s)                      # SiLU (tanh form), f32 epilogue

    # Mask padded patch rows (SiLU(0 + bias) != 0) so GAP stays unbiased.
    row = lax.broadcasted_iota(jnp.int32, s.shape, 0) + p * tile_p
    s = jnp.where(row < true_p, s, 0.0)

    # Per-step: only VPU vreg adds into the (8, C0) accumulator.
    c0 = acc_ref.shape[-1]
    acc_ref[...] += s.reshape(-1, 8, c0).sum(axis=0)

    @pl.when(p == pl.num_programs(1) - 1)
    def _():
        # One cross-sublane (XLU) reduce per image, then mean over TRUE P.
        pooled = jnp.sum(acc_ref[...], axis=0, keepdims=True) * inv_p  # (1, C0)
        f = jnp.dot(pooled.astype(jnp.bfloat16), wp_ref[...],
                    preferred_element_type=jnp.float32)
        f = f + bp_ref[...]
        f = f * _sigmoid1(f)                                           # SiLU
        o_ref[...] = f.reshape(o_ref.shape).astype(o_ref.dtype)


def _head_kernel(feat_ref, wa1_ref, wa2_ref, wc1_ref, wc2_ref, wc3_ref,
                 wc4_ref, bias_ref, o_ref):
    """Entire attention gate + classifier head, one VMEM-resident kernel.

    All matmuls are bf16 x bf16 -> f32; epilogue math stays in f32.
    BatchNorm1d (eval) scale is pre-folded into the weights; the Linear bias +
    BN shift are pre-folded into a single shift row of bias_ref.
    bias_ref rows: 0=b_a1, 1=b_a2, 2=shift_c1, 3=shift_c2, 4=shift_c3, 5=b_c4.
    Dropout is identity in eval mode.
    """
    d_a1 = wa1_ref.shape[1]
    d_f = wa2_ref.shape[1]
    d_c1 = wc1_ref.shape[1]
    d_c2 = wc2_ref.shape[1]
    d_c3 = wc3_ref.shape[1]
    d_c4 = wc4_ref.shape[1]

    feat_bf = feat_ref[...]                                   # (TB, F) bf16
    feat = feat_bf.astype(jnp.float32)

    # attention: Linear(F, F/4) -> ReLU -> Linear(F/4, F) -> Sigmoid -> gate
    h = jnp.dot(feat_bf, wa1_ref[...], preferred_element_type=jnp.float32)
    h = jnp.maximum(h + bias_ref[0:1, :d_a1], 0.0)
    a = jnp.dot(h.astype(jnp.bfloat16), wa2_ref[...],
                preferred_element_type=jnp.float32) + bias_ref[1:2, :d_f]
    x = feat * _sigmoid1(a)                                   # attended, f32

    # classifier: (Linear -> BN -> ReLU -> Dropout) x3 -> Linear
    x = jnp.dot(x.astype(jnp.bfloat16), wc1_ref[...],
                preferred_element_type=jnp.float32)
    x = jnp.maximum(x + bias_ref[2:3, :d_c1], 0.0)
    x = jnp.dot(x.astype(jnp.bfloat16), wc2_ref[...],
                preferred_element_type=jnp.float32)
    x = jnp.maximum(x + bias_ref[3:4, :d_c2], 0.0)
    x = jnp.dot(x.astype(jnp.bfloat16), wc3_ref[...],
                preferred_element_type=jnp.float32)
    x = jnp.maximum(x + bias_ref[4:5, :d_c3], 0.0)
    y = jnp.dot(x.astype(jnp.bfloat16), wc4_ref[...],
                preferred_element_type=jnp.float32) + bias_ref[5:6, :d_c4]
    o_ref[...] = y.astype(o_ref.dtype)


# ----------------------------------------------------------------------------
# Pallas wrappers
# ----------------------------------------------------------------------------
def stem_gap_proj(patches, w_stem, b_stem, w_proj, b_proj, *, tile_p=2048):
    """patches (B, P, K) bf16 -> features (B, F) bf16, fused in one call."""
    B, P, K = patches.shape
    C0 = w_stem.shape[1]
    F = w_proj.shape[1]

    # Tile decoupled from divisibility: pad P up to a tile multiple and mask
    # pad rows inside the kernel (inv_p keeps the TRUE P).
    tp = _round_up(min(tile_p, _round_up(P, 8)), 8)
    P_pad = _round_up(P, tp)
    if P_pad != P:
        patches = jnp.pad(patches, ((0, 0), (0, P_pad - P), (0, 0)))
    pt = P_pad // tp

    kernel = functools.partial(_stem_gap_proj_kernel,
                               true_p=P, inv_p=1.0 / P, tile_p=tp)
    cost = pl.CostEstimate(
        flops=int(2 * B * P_pad * K * C0 + 2 * B * C0 * F),
        transcendentals=int(B * P_pad * C0 + B * F),
        bytes_accessed=int(B * P_pad * K * 2 + (K * C0 + C0 * F) * 2
                           + (C0 + F) * 4 + B * F * 2))

    out = pl.pallas_call(
        kernel,
        out_shape=jax.ShapeDtypeStruct((B, 1, F), jnp.bfloat16),
        grid_spec=pltpu.PrefetchScalarGridSpec(
            num_scalar_prefetch=0,
            grid=(B, pt),
            in_specs=[
                pl.BlockSpec((1, tp, K), lambda b, k: (b, k, 0)),   # patch tile
                pl.BlockSpec((K, C0), lambda b, k: (0, 0)),         # resident
                pl.BlockSpec((1, C0), lambda b, k: (0, 0)),         # resident
                pl.BlockSpec((C0, F), lambda b, k: (0, 0)),         # resident
                pl.BlockSpec((1, F), lambda b, k: (0, 0)),          # resident
            ],
            out_specs=pl.BlockSpec((1, 1, F), lambda b, k: (b, 0, 0)),
            scratch_shapes=[pltpu.VMEM((8, C0), jnp.float32)],
        ),
        compiler_params=pltpu.CompilerParams(
            dimension_semantics=("parallel", "arbitrary"),
            vmem_limit_bytes=_VMEM_LIMIT),
        cost_estimate=cost,
    )(patches, w_stem, b_stem, w_proj, b_proj)
    return out.reshape(B, F)


def attention_classifier_head(feat, p, *, tile_b=256):
    """Attention + classifier head, tiled over batch rows, weights resident."""
    B, F = feat.shape
    n_pad = p["w_c4"].shape[1]
    d_a1 = p["w_a1"].shape[1]

    # Batch tiling: pad B up to a multiple of the (8-aligned) row tile.
    tb = _round_up(min(tile_b, _round_up(B, 8)), 8)
    B_pad = _round_up(B, tb)
    if B_pad != B:
        feat = jnp.pad(feat, ((0, B_pad - B), (0, 0)))

    w_bytes = sum(int(p[k].size) * 2
                  for k in ("w_a1", "w_a2", "w_c1", "w_c2", "w_c3", "w_c4"))
    cost = pl.CostEstimate(
        flops=int(2 * B_pad * (F * d_a1 + d_a1 * F + F * 1024 + 1024 * 512
                               + 512 * 256 + 256 * n_pad)),
        transcendentals=int(B_pad * F),
        bytes_accessed=int(B_pad * F * 2 + w_bytes
                           + int(p["bias_pack"].size) * 4 + B_pad * n_pad * 4))

    out = pl.pallas_call(
        _head_kernel,
        out_shape=jax.ShapeDtypeStruct((B_pad, n_pad), jnp.float32),
        grid_spec=pltpu.PrefetchScalarGridSpec(
            num_scalar_prefetch=0,
            grid=(B_pad // tb,),
            in_specs=[
                pl.BlockSpec((tb, F), lambda i: (i, 0)),
                pl.BlockSpec(p["w_a1"].shape, lambda i: (0, 0)),
                pl.BlockSpec(p["w_a2"].shape, lambda i: (0, 0)),
                pl.BlockSpec(p["w_c1"].shape, lambda i: (0, 0)),
                pl.BlockSpec(p["w_c2"].shape, lambda i: (0, 0)),
                pl.BlockSpec(p["w_c3"].shape, lambda i: (0, 0)),
                pl.BlockSpec(p["w_c4"].shape, lambda i: (0, 0)),
                pl.BlockSpec(p["bias_pack"].shape, lambda i: (0, 0)),
            ],
            out_specs=pl.BlockSpec((tb, n_pad), lambda i: (i, 0)),
        ),
        compiler_params=pltpu.CompilerParams(
            dimension_semantics=("parallel",),
            vmem_limit_bytes=_VMEM_LIMIT),
        cost_estimate=cost,
    )(feat, p["w_a1"], p["w_a2"], p["w_c1"], p["w_c2"], p["w_c3"], p["w_c4"],
      p["bias_pack"])
    return out[:B]


# ----------------------------------------------------------------------------
# Deterministic parameter construction
# ----------------------------------------------------------------------------
def init_linear(key, fan_in, fan_out):
    k1, k2 = jax.random.split(key)
    w = jax.random.normal(k1, (fan_in, fan_out), jnp.float32) / jnp.sqrt(
        jnp.float32(fan_in))
    b = 0.01 * jax.random.normal(k2, (fan_out,), jnp.float32)
    return w, b


def init_bn(key, n, eps=1e-5):
    k1, k2, k3, k4 = jax.random.split(key, 4)
    gamma = 1.0 + 0.1 * jax.random.normal(k1, (n,), jnp.float32)
    beta = 0.1 * jax.random.normal(k2, (n,), jnp.float32)
    running_mean = 0.1 * jax.random.normal(k3, (n,), jnp.float32)
    running_var = jnp.abs(jax.random.normal(k4, (n,), jnp.float32)) + 0.5
    scale = gamma / jnp.sqrt(running_var + eps)
    shift = beta - running_mean * scale
    return scale, shift


def build_params(key, feature_dim=256, num_classes=7, stem_ch=32,
                 patch_k=27, padded_k=32, pad_classes=128):
    keys = jax.random.split(key, 12)
    F = feature_dim
    # backbone surrogate (K padded 27->32; padded weight rows are ZERO so
    # zero-padded patch columns contribute nothing)
    w_stem27, b_stem = init_linear(keys[0], patch_k, stem_ch)
    w_stem = jnp.zeros((padded_k, stem_ch), jnp.float32).at[:patch_k].set(w_stem27)
    w_proj, b_proj = init_linear(keys[1], stem_ch, F)
    # attention head
    w_a1, b_a1 = init_linear(keys[2], F, F // 4)
    w_a2, b_a2 = init_linear(keys[3], F // 4, F)
    # classifier head
    w_c1, b_c1 = init_linear(keys[4], F, 1024)
    s1, t1 = init_bn(keys[5], 1024)
    w_c2, b_c2 = init_linear(keys[6], 1024, 512)
    s2, t2 = init_bn(keys[7], 512)
    w_c3, b_c3 = init_linear(keys[8], 512, 256)
    s3, t3 = init_bn(keys[9], 256)
    w_c4, b_c4 = init_linear(keys[10], 256, num_classes)

    row = lambda v: v.reshape(1, -1).astype(jnp.float32)
    bf = lambda w: w.astype(jnp.bfloat16)

    p = {}
    p["w_stem"], p["b_stem"] = bf(w_stem), row(b_stem)
    p["w_proj"], p["b_proj"] = bf(w_proj), row(b_proj)
    p["w_a1"], p["w_a2"] = bf(w_a1), bf(w_a2)

    # Fold BN (eval) fully into the Linear layers:
    #   y = (x@W + b)*scale + shift = x@(W*scale) + (b*scale + shift)
    p["w_c1"] = bf(w_c1 * s1[None, :])
    p["w_c2"] = bf(w_c2 * s2[None, :])
    p["w_c3"] = bf(w_c3 * s3[None, :])
    sh1 = b_c1 * s1 + t1
    sh2 = b_c2 * s2 + t2
    sh3 = b_c3 * s3 + t3

    # final layer padded to a lane-dense 128-wide output (zero columns)
    w_c4p = jnp.zeros((256, pad_classes), jnp.float32).at[:, :num_classes].set(w_c4)
    b_c4p = jnp.zeros((pad_classes,), jnp.float32).at[:num_classes].set(b_c4)
    p["w_c4"] = bf(w_c4p)

    # Pack all head bias/shift vectors into ONE (8, max_w) f32 operand.
    max_w = _round_up(max(1024, F), 128)
    bias_pack = jnp.zeros((8, max_w), jnp.float32)
    for i, v in enumerate([b_a1, b_a2, sh1, sh2, sh3, b_c4p]):
        bias_pack = bias_pack.at[i, :v.shape[0]].set(v)
    p["bias_pack"] = bias_pack
    return p


# ----------------------------------------------------------------------------
# Forward pass
# ----------------------------------------------------------------------------
def optimized_ent_model_forward(x_nchw, p, *, num_classes=7, stem_tile_p=2048,
                                head_tile_b=256):
    B = x_nchw.shape[0]

    # ---- backbone surrogate (see TODO(synk) above) ----
    # Cast to bf16 BEFORE patch extraction so the im2col tensor never
    # materializes in f32 (halves that HBM round-trip).
    x_nhwc = jnp.transpose(x_nchw, (0, 2, 3, 1)).astype(jnp.bfloat16)
    patches = lax.conv_general_dilated_patches(
        x_nhwc,
        filter_shape=(3, 3),
        window_strides=(2, 2),
        padding="SAME",
        dimension_numbers=("NHWC", "HWIO", "NHWC"),
    )                                                        # (B, OH, OW, 27) bf16
    _, OH, OW, PD = patches.shape
    K_pad = p["w_stem"].shape[0]                             # 32
    P = OH * OW
    patches = patches.reshape(B, P, PD)
    patches = jnp.pad(patches, ((0, 0), (0, 0), (0, K_pad - PD)))

    # fused conv-stem matmul + SiLU + GAP + projection + SiLU  -> (B, F) bf16
    features = stem_gap_proj(patches, p["w_stem"], p["b_stem"],
                             p["w_proj"], p["b_proj"], tile_p=stem_tile_p)

    # ---- attention + classifier head (exact, eval mode), one fused kernel ----
    logits_padded = attention_classifier_head(features, p, tile_b=head_tile_b)
    return logits_padded[:, :num_classes]


# ----------------------------------------------------------------------------
# Demo
# ----------------------------------------------------------------------------
if __name__ == "__main__":
    key = jax.random.PRNGKey(0)
    k_x, k_p = jax.random.split(key)

    B, C, H, W = 2, 3, 18, 18          # small NCHW image input (RGB)
    FEATURE_DIM = 256                  # small stand-in for b7's 2560 (div. by 4)
    NUM_CLASSES = 7

    x = jax.random.normal(k_x, (B, C, H, W), jnp.float32)
    params = build_params(k_p, feature_dim=FEATURE_DIM, num_classes=NUM_CLASSES)

    # stem_tile_p=16 so the demo (P = 9*9 = 81 patch rows/image, padded to 96)
    # exercises BOTH multi-step GAP accumulation and pad-row masking;
    # keep the default 2048 (or larger) for full-size images.
    fwd = jax.jit(functools.partial(optimized_ent_model_forward,
                                    num_classes=NUM_CLASSES, stem_tile_p=16))
    logits = fwd(x, params)
    jax.block_until_ready(logits)

    assert logits.shape == (B, NUM_CLASSES), logits.shape
    assert bool(jnp.all(jnp.isfinite(logits)))
    print("KERNEL_OK")
</pallas_src>

<mosaic_0001>
module attributes {stable_mosaic.version = 11 : i64} {
  func.func @_stem_gap_proj_kernel(%arg0: i32, %arg1: i32, %arg2: memref<1x16x32xbf16, #tpu.memory_space<vmem>>, %arg3: memref<32x32xbf16, #tpu.memory_space<vmem>>, %arg4: memref<1x32xf32, #tpu.memory_space<vmem>>, %arg5: memref<32x256xbf16, #tpu.memory_space<vmem>>, %arg6: memref<1x256xf32, #tpu.memory_space<vmem>>, %arg7: memref<1x1x256xbf16, #tpu.memory_space<vmem>>, %arg8: memref<8x32xf32, #tpu.memory_space<vmem>>) attributes {dimension_semantics = [#tpu.dimension_semantics<parallel>, #tpu.dimension_semantics<arbitrary>], iteration_bounds = array<i64: 2, 6>, scalar_prefetch = 0 : i64, scratch_operands = 1 : i64, tpu.core_type = #tpu.core_type<tc>, window_params = [{transform_indices = @transform_0, window_bounds = array<i64: 1, 16, 32>}, {pipeline_mode = #tpu.pipeline_mode<synchronous>, transform_indices = @transform_1, window_bounds = array<i64: 32, 32>}, {pipeline_mode = #tpu.pipeline_mode<synchronous>, transform_indices = @transform_2, window_bounds = array<i64: 1, 32>}, {pipeline_mode = #tpu.pipeline_mode<synchronous>, transform_indices = @transform_3, window_bounds = array<i64: 32, 256>}, {pipeline_mode = #tpu.pipeline_mode<synchronous>, transform_indices = @transform_4, window_bounds = array<i64: 1, 256>}, {transform_indices = @transform_5, window_bounds = array<i64: 1, 1, 256>}]} {
    %c0_i32 = arith.constant 0 : i32
    %0 = arith.cmpi eq, %arg1, %c0_i32 : i32
    %1 = arith.extui %0 : i1 to i32
    %c0_i32_0 = arith.constant 0 : i32
    %2 = arith.cmpi ne, %1, %c0_i32_0 : i32
    scf.if %2 {
      %cst_17 = arith.constant 0.000000e+00 : f32
      %34 = vector.broadcast %cst_17 : f32 to vector<8x32xf32>
      %c0_18 = arith.constant 0 : index
      %c0_19 = arith.constant 0 : index
      %35 = vector.load %arg8[%c0_18, %c0_19] : memref<8x32xf32, #tpu.memory_space<vmem>>, vector<8x32xf32>
      tpu.vector_store %arg8[%c0_18, %c0_19], %34 {strides = array<i32>} : memref<8x32xf32, #tpu.memory_space<vmem>>, vector<8x32xf32>,
    } else {
    }
    %c0 = arith.constant 0 : index
    %c0_1 = arith.constant 0 : index
    %c0_2 = arith.constant 0 : index
    %3 = vector.load %arg2[%c0, %c0_1, %c0_2] : memref<1x16x32xbf16, #tpu.memory_space<vmem>>, vector<1x16x32xbf16>
    %4 = vector.shape_cast %3 : vector<1x16x32xbf16> to vector<16x32xbf16>
    %c0_3 = arith.constant 0 : index
    %c0_4 = arith.constant 0 : index
    %5 = vector.load %arg3[%c0_3, %c0_4] : memref<32x32xbf16, #tpu.memory_space<vmem>>, vector<32x32xbf16>
    %cst = arith.constant dense<0.000000e+00> : vector<16x32xf32>
    %6 = tpu.matmul %4, %5, %cst {dimension_numbers = #tpu.dot_dimension_numbers<[1], [0], [0], [1], [0, 0, 1, 1], [], []>} : vector<16x32xbf16>, vector<32x32xbf16>, vector<16x32xf32> -> vector<16x32xf32>
    %c0_5 = arith.constant 0 : index
    %c0_6 = arith.constant 0 : index
    %7 = vector.load %arg4[%c0_5, %c0_6] : memref<1x32xf32, #tpu.memory_space<vmem>>, vector<1x32xf32>
    %8 = vector.broadcast %7 : vector<1x32xf32> to vector<16x32xf32>
    %9 = arith.addf %6, %8 : vector<16x32xf32>
    %cst_7 = arith.constant 5.000000e-01 : f32
    %10 = vector.broadcast %cst_7 : f32 to vector<16x32xf32>
    %11 = arith.mulf %10, %9 : vector<16x32xf32>
    %12 = math.tanh %11 : vector<16x32xf32>
    %cst_8 = arith.constant 5.000000e-01 : f32
    %13 = vector.broadcast %cst_8 : f32 to vector<16x32xf32>
    %14 = arith.mulf %13, %12 : vector<16x32xf32>
    %cst_9 = arith.constant 5.000000e-01 : f32
    %15 = vector.broadcast %cst_9 : f32 to vector<16x32xf32>
    %16 = arith.addf %14, %15 : vector<16x32xf32>
    %17 = arith.mulf %9, %16 : vector<16x32xf32>
    %18 = tpu.iota {dimensions = array<i32: 0>} : vector<16x32xi32>
    %c16_i32 = arith.constant 16 : i32
    %19 = arith.muli %arg1, %c16_i32 : i32
    %20 = vector.broadcast %19 : i32 to vector<16x32xi32>
    %21 = arith.addi %18, %20 : vector<16x32xi32>
    %c81_i32 = arith.constant 81 : i32
    %22 = vector.broadcast %c81_i32 : i32 to vector<16x32xi32>
    %23 = arith.cmpi slt, %21, %22 : vector<16x32xi32>
    %cst_10 = arith.constant 0.000000e+00 : f32
    %24 = vector.broadcast %cst_10 : f32 to vector<16x32xf32>
    %25 = arith.select %23, %17, %24 : vector<16x32xi1>, vector<16x32xf32>
    %c0_11 = arith.constant 0 : index
    %c0_12 = arith.constant 0 : index
    %26 = vector.load %arg8[%c0_11, %c0_12] : memref<8x32xf32, #tpu.memory_space<vmem>>, vector<8x32xf32>
    %27 = vector.shape_cast %25 : vector<16x32xf32> to vector<2x8x32xf32>
    %cst_13 = arith.constant dense<0.000000e+00> : vector<8x32xf32>
    %28 = vector.multi_reduction <add>, %27, %cst_13 [0] : vector<2x8x32xf32> to vector<8x32xf32>
    %29 = arith.addf %26, %28 : vector<8x32xf32>
    %c0_14 = arith.constant 0 : index
    %c0_15 = arith.constant 0 : index
    %30 = vector.load %arg8[%c0_14, %c0_15] : memref<8x32xf32, #tpu.memory_space<vmem>>, vector<8x32xf32>
    tpu.vector_store %arg8[%c0_14, %c0_15], %29 {strides = array<i32>} : memref<8x32xf32, #tpu.memory_space<vmem>>, vector<8x32xf32>,
    %c5_i32 = arith.constant 5 : i32
    %31 = arith.cmpi eq, %arg1, %c5_i32 : i32
    %32 = arith.extui %31 : i1 to i32
    %c0_i32_16 = arith.constant 0 : i32
    %33 = arith.cmpi ne, %32, %c0_i32_16 : i32
    scf.if %33 {
      %c0_17 = arith.constant 0 : index
      %c0_18 = arith.constant 0 : index
      %34 = vector.load %arg8[%c0_17, %c0_18] : memref<8x32xf32, #tpu.memory_space<vmem>>, vector<8x32xf32>
      %cst_19 = arith.constant dense<0.000000e+00> : vector<32xf32>
      %35 = vector.multi_reduction <add>, %34, %cst_19 [0] : vector<8x32xf32> to vector<32xf32>
      %36 = vector.shape_cast %35 : vector<32xf32> to vector<1x32xf32>
      %cst_20 = arith.constant 0.0123456791 : f32
      %37 = vector.broadcast %cst_20 : f32 to vector<1x32xf32>
      %38 = arith.mulf %36, %37 : vector<1x32xf32>
      %39 = arith.truncf %38 : vector<1x32xf32> to vector<1x32xbf16>
      %c0_21 = arith.constant 0 : index
      %c0_22 = arith.constant 0 : index
      %40 = vector.load %arg5[%c0_21, %c0_22] : memref<32x256xbf16, #tpu.memory_space<vmem>>, vector<32x256xbf16>
      %cst_23 = arith.constant dense<0.000000e+00> : vector<1x256xf32>
      %41 = tpu.matmul %39, %40, %cst_23 {dimension_numbers = #tpu.dot_dimension_numbers<[1], [0], [0], [1], [0, 0, 1, 1], [], []>} : vector<1x32xbf16>, vector<32x256xbf16>, vector<1x256xf32> -> vector<1x256xf32>
      %c0_24 = arith.constant 0 : index
      %c0_25 = arith.constant 0 : index
      %42 = vector.load %arg6[%c0_24, %c0_25] : memref<1x256xf32, #tpu.memory_space<vmem>>, vector<1x256xf32>
      %43 = arith.addf %41, %42 : vector<1x256xf32>
      %cst_26 = arith.constant 5.000000e-01 : f32
      %44 = vector.broadcast %cst_26 : f32 to vector<1x256xf32>
      %45 = arith.mulf %44, %43 : vector<1x256xf32>
      %46 = math.tanh %45 : vector<1x256xf32>
      %cst_27 = arith.constant 5.000000e-01 : f32
      %47 = vector.broadcast %cst_27 : f32 to vector<1x256xf32>
      %48 = arith.mulf %47, %46 : vector<1x256xf32>
      %cst_28 = arith.constant 5.000000e-01 : f32
      %49 = vector.broadcast %cst_28 : f32 to vector<1x256xf32>
      %50 = arith.addf %48, %49 : vector<1x256xf32>
      %51 = arith.mulf %43, %50 : vector<1x256xf32>
      %52 = vector.shape_cast %51 : vector<1x256xf32> to vector<1x1x256xf32>
      %53 = arith.truncf %52 : vector<1x1x256xf32> to vector<1x1x256xbf16>
      %c0_29 = arith.constant 0 : index
      %c0_30 = arith.constant 0 : index
      %c0_31 = arith.constant 0 : index
      %54 = vector.load %arg7[%c0_29, %c0_30, %c0_31] : memref<1x1x256xbf16, #tpu.memory_space<vmem>>, vector<1x1x256xbf16>
      tpu.vector_store %arg7[%c0_29, %c0_30, %c0_31], %53 {strides = array<i32>} : memref<1x1x256xbf16, #tpu.memory_space<vmem>>, vector<1x1x256xbf16>,
    } else {
    }
    return
  }
  func.func @transform_0(%arg0: i32, %arg1: i32) -> (i32, i32, i32) {
    %c0_i32 = arith.constant 0 : i32
    %c0_i32_0 = arith.constant 0 : i32
    return %arg0, %arg1, %c0_i32 : i32, i32, i32
  }
  func.func @transform_1(%arg0: i32, %arg1: i32) -> (i32, i32) {
    %c0_i32 = arith.constant 0 : i32
    %c0_i32_0 = arith.constant 0 : i32
    %c0_i32_1 = arith.constant 0 : i32
    return %c0_i32, %c0_i32_0 : i32, i32
  }
  func.func @transform_2(%arg0: i32, %arg1: i32) -> (i32, i32) {
    %c0_i32 = arith.constant 0 : i32
    %c0_i32_0 = arith.constant 0 : i32
    %c0_i32_1 = arith.constant 0 : i32
    return %c0_i32, %c0_i32_0 : i32, i32
  }
  func.func @transform_3(%arg0: i32, %arg1: i32) -> (i32, i32) {
    %c0_i32 = arith.constant 0 : i32
    %c0_i32_0 = arith.constant 0 : i32
    %c0_i32_1 = arith.constant 0 : i32
    return %c0_i32, %c0_i32_0 : i32, i32
  }
  func.func @transform_4(%arg0: i32, %arg1: i32) -> (i32, i32) {
    %c0_i32 = arith.constant 0 : i32
    %c0_i32_0 = arith.constant 0 : i32
    %c0_i32_1 = arith.constant 0 : i32
    return %c0_i32, %c0_i32_0 : i32, i32
  }
  func.func @transform_5(%arg0: i32, %arg1: i32) -> (i32, i32, i32) {
    %c0_i32 = arith.constant 0 : i32
    %c0_i32_0 = arith.constant 0 : i32
    %c0_i32_1 = arith.constant 0 : i32
    return %arg0, %c0_i32, %c0_i32_0 : i32, i32, i32
  }
}

module attributes {stable_mosaic.version = 11 : i64} {
  func.func @_head_kernel(%arg0: i32, %arg1: memref<8x256xbf16, #tpu.memory_space<vmem>>, %arg2: memref<256x64xbf16, #tpu.memory_space<vmem>>, %arg3: memref<64x256xbf16, #tpu.memory_space<vmem>>, %arg4: memref<256x1024xbf16, #tpu.memory_space<vmem>>, %arg5: memref<1024x512xbf16, #tpu.memory_space<vmem>>, %arg6: memref<512x256xbf16, #tpu.memory_space<vmem>>, %arg7: memref<256x128xbf16, #tpu.memory_space<vmem>>, %arg8: memref<8x1024xf32, #tpu.memory_space<vmem>>, %arg9: memref<8x128xf32, #tpu.memory_space<vmem>>) attributes {dimension_semantics = [#tpu.dimension_semantics<parallel>], iteration_bounds = array<i64: 1>, scalar_prefetch = 0 : i64, scratch_operands = 0 : i64, tpu.core_type = #tpu.core_type<tc>, window_params = [{transform_indices = @transform_0, window_bounds = array<i64: 8, 256>}, {pipeline_mode = #tpu.pipeline_mode<synchronous>, transform_indices = @transform_1, window_bounds = array<i64: 256, 64>}, {pipeline_mode = #tpu.pipeline_mode<synchronous>, transform_indices = @transform_2, window_bounds = array<i64: 64, 256>}, {pipeline_mode = #tpu.pipeline_mode<synchronous>, transform_indices = @transform_3, window_bounds = array<i64: 256, 1024>}, {pipeline_mode = #tpu.pipeline_mode<synchronous>, transform_indices = @transform_4, window_bounds = array<i64: 1024, 512>}, {pipeline_mode = #tpu.pipeline_mode<synchronous>, transform_indices = @transform_5, window_bounds = array<i64: 512, 256>}, {pipeline_mode = #tpu.pipeline_mode<synchronous>, transform_indices = @transform_6, window_bounds = array<i64: 256, 128>}, {pipeline_mode = #tpu.pipeline_mode<synchronous>, transform_indices = @transform_7, window_bounds = array<i64: 8, 1024>}, {transform_indices = @transform_8, window_bounds = array<i64: 8, 128>}]} {
    %c0 = arith.constant 0 : index
    %c0_0 = arith.constant 0 : index
    %0 = vector.load %arg1[%c0, %c0_0] : memref<8x256xbf16, #tpu.memory_space<vmem>>, vector<8x256xbf16>
    %1 = arith.extf %0 : vector<8x256xbf16> to vector<8x256xf32>
    %c0_1 = arith.constant 0 : index
    %c0_2 = arith.constant 0 : index
    %2 = vector.load %arg2[%c0_1, %c0_2] : memref<256x64xbf16, #tpu.memory_space<vmem>>, vector<256x64xbf16>
    %cst = arith.constant dense<0.000000e+00> : vector<8x64xf32>
    %3 = tpu.matmul %0, %2, %cst {dimension_numbers = #tpu.dot_dimension_numbers<[1], [0], [0], [1], [0, 0, 1, 1], [], []>} : vector<8x256xbf16>, vector<256x64xbf16>, vector<8x64xf32> -> vector<8x64xf32>
    %c0_3 = arith.constant 0 : index
    %c0_4 = arith.constant 0 : index
    %4 = vector.load %arg8[%c0_3, %c0_4] : memref<8x1024xf32, #tpu.memory_space<vmem>>, vector<1x64xf32>
    %5 = vector.broadcast %4 : vector<1x64xf32> to vector<8x64xf32>
    %6 = arith.addf %3, %5 : vector<8x64xf32>
    %cst_5 = arith.constant 0.000000e+00 : f32
    %7 = vector.broadcast %cst_5 : f32 to vector<8x64xf32>
    %8 = arith.maximumf %6, %7 : vector<8x64xf32>
    %9 = arith.truncf %8 : vector<8x64xf32> to vector<8x64xbf16>
    %c0_6 = arith.constant 0 : index
    %c0_7 = arith.constant 0 : index
    %10 = vector.load %arg3[%c0_6, %c0_7] : memref<64x256xbf16, #tpu.memory_space<vmem>>, vector<64x256xbf16>
    %cst_8 = arith.constant dense<0.000000e+00> : vector<8x256xf32>
    %11 = tpu.matmul %9, %10, %cst_8 {dimension_numbers = #tpu.dot_dimension_numbers<[1], [0], [0], [1], [0, 0, 1, 1], [], []>} : vector<8x64xbf16>, vector<64x256xbf16>, vector<8x256xf32> -> vector<8x256xf32>
    %c1 = arith.constant 1 : index
    %c0_9 = arith.constant 0 : index
    %12 = vector.load %arg8[%c1, %c0_9] : memref<8x1024xf32, #tpu.memory_space<vmem>>, vector<1x256xf32>
    %13 = vector.broadcast %12 : vector<1x256xf32> to vector<8x256xf32>
    %14 = arith.addf %11, %13 : vector<8x256xf32>
    %cst_10 = arith.constant 5.000000e-01 : f32
    %15 = vector.broadcast %cst_10 : f32 to vector<8x256xf32>
    %16 = arith.mulf %15, %14 : vector<8x256xf32>
    %17 = math.tanh %16 : vector<8x256xf32>
    %cst_11 = arith.constant 5.000000e-01 : f32
    %18 = vector.broadcast %cst_11 : f32 to vector<8x256xf32>
    %19 = arith.mulf %18, %17 : vector<8x256xf32>
    %cst_12 = arith.constant 5.000000e-01 : f32
    %20 = vector.broadcast %cst_12 : f32 to vector<8x256xf32>
    %21 = arith.addf %19, %20 : vector<8x256xf32>
    %22 = arith.mulf %1, %21 : vector<8x256xf32>
    %23 = arith.truncf %22 : vector<8x256xf32> to vector<8x256xbf16>
    %c0_13 = arith.constant 0 : index
    %c0_14 = arith.constant 0 : index
    %24 = vector.load %arg4[%c0_13, %c0_14] : memref<256x1024xbf16, #tpu.memory_space<vmem>>, vector<256x1024xbf16>
    %cst_15 = arith.constant dense<0.000000e+00> : vector<8x1024xf32>
    %25 = tpu.matmul %23, %24, %cst_15 {dimension_numbers = #tpu.dot_dimension_numbers<[1], [0], [0], [1], [0, 0, 1, 1], [], []>} : vector<8x256xbf16>, vector<256x1024xbf16>, vector<8x1024xf32> -> vector<8x1024xf32>
    %c2 = arith.constant 2 : index
    %c0_16 = arith.constant 0 : index
    %26 = vector.load %arg8[%c2, %c0_16] : memref<8x1024xf32, #tpu.memory_space<vmem>>, vector<1x1024xf32>
    %27 = vector.broadcast %26 : vector<1x1024xf32> to vector<8x1024xf32>
    %28 = arith.addf %25, %27 : vector<8x1024xf32>
    %cst_17 = arith.constant 0.000000e+00 : f32
    %29 = vector.broadcast %cst_17 : f32 to vector<8x1024xf32>
    %30 = arith.maximumf %28, %29 : vector<8x1024xf32>
    %31 = arith.truncf %30 : vector<8x1024xf32> to vector<8x1024xbf16>
    %c0_18 = arith.constant 0 : index
    %c0_19 = arith.constant 0 : index
    %32 = vector.load %arg5[%c0_18, %c0_19] : memref<1024x512xbf16, #tpu.memory_space<vmem>>, vector<1024x512xbf16>
    %cst_20 = arith.constant dense<0.000000e+00> : vector<8x512xf32>
    %33 = tpu.matmul %31, %32, %cst_20 {dimension_numbers = #tpu.dot_dimension_numbers<[1], [0], [0], [1], [0, 0, 1, 1], [], []>} : vector<8x1024xbf16>, vector<1024x512xbf16>, vector<8x512xf32> -> vector<8x512xf32>
    %c3 = arith.constant 3 : index
    %c0_21 = arith.constant 0 : index
    %34 = vector.load %arg8[%c3, %c0_21] : memref<8x1024xf32, #tpu.memory_space<vmem>>, vector<1x512xf32>
    %35 = vector.broadcast %34 : vector<1x512xf32> to vector<8x512xf32>
    %36 = arith.addf %33, %35 : vector<8x512xf32>
    %cst_22 = arith.constant 0.000000e+00 : f32
    %37 = vector.broadcast %cst_22 : f32 to vector<8x512xf32>
    %38 = arith.maximumf %36, %37 : vector<8x512xf32>
    %39 = arith.truncf %38 : vector<8x512xf32> to vector<8x512xbf16>
    %c0_23 = arith.constant 0 : index
    %c0_24 = arith.constant 0 : index
    %40 = vector.load %arg6[%c0_23, %c0_24] : memref<512x256xbf16, #tpu.memory_space<vmem>>, vector<512x256xbf16>
    %cst_25 = arith.constant dense<0.000000e+00> : vector<8x256xf32>
    %41 = tpu.matmul %39, %40, %cst_25 {dimension_numbers = #tpu.dot_dimension_numbers<[1], [0], [0], [1], [0, 0, 1, 1], [], []>} : vector<8x512xbf16>, vector<512x256xbf16>, vector<8x256xf32> -> vector<8x256xf32>
    %c4 = arith.constant 4 : index
    %c0_26 = arith.constant 0 : index
    %42 = vector.load %arg8[%c4, %c0_26] : memref<8x1024xf32, #tpu.memory_space<vmem>>, vector<1x256xf32>
    %43 = vector.broadcast %42 : vector<1x256xf32> to vector<8x256xf32>
    %44 = arith.addf %41, %43 : vector<8x256xf32>
    %cst_27 = arith.constant 0.000000e+00 : f32
    %45 = vector.broadcast %cst_27 : f32 to vector<8x256xf32>
    %46 = arith.maximumf %44, %45 : vector<8x256xf32>
    %47 = arith.truncf %46 : vector<8x256xf32> to vector<8x256xbf16>
    %c0_28 = arith.constant 0 : index
    %c0_29 = arith.constant 0 : index
    %48 = vector.load %arg7[%c0_28, %c0_29] : memref<256x128xbf16, #tpu.memory_space<vmem>>, vector<256x128xbf16>
    %cst_30 = arith.constant dense<0.000000e+00> : vector<8x128xf32>
    %49 = tpu.matmul %47, %48, %cst_30 {dimension_numbers = #tpu.dot_dimension_numbers<[1], [0], [0], [1], [0, 0, 1, 1], [], []>} : vector<8x256xbf16>, vector<256x128xbf16>, vector<8x128xf32> -> vector<8x128xf32>
    %c5 = arith.constant 5 : index
    %c0_31 = arith.constant 0 : index
    %50 = vector.load %arg8[%c5, %c0_31] : memref<8x1024xf32, #tpu.memory_space<vmem>>, vector<1x128xf32>
    %51 = vector.broadcast %50 : vector<1x128xf32> to vector<8x128xf32>
    %52 = arith.addf %49, %51 : vector<8x128xf32>
    %c0_32 = arith.constant 0 : index
    %c0_33 = arith.constant 0 : index
    %53 = vector.load %arg9[%c0_32, %c0_33] : memref<8x128xf32, #tpu.memory_space<vmem>>, vector<8x128xf32>
    tpu.vector_store %arg9[%c0_32, %c0_33], %52 {strides = array<i32>} : memref<8x128xf32, #tpu.memory_space<vmem>>, vector<8x128xf32>,
    return
  }
  func.func @transform_0(%arg0: i32) -> (i32, i32) {
    %c0_i32 = arith.constant 0 : i32
    %c0_i32_0 = arith.constant 0 : i32
    return %arg0, %c0_i32 : i32, i32
  }
  func.func @transform_1(%arg0: i32) -> (i32, i32) {
    %c0_i32 = arith.constant 0 : i32
    %c0_i32_0 = arith.constant 0 : i32
    %c0_i32_1 = arith.constant 0 : i32
    return %c0_i32, %c0_i32_0 : i32, i32
  }
  func.func @transform_2(%arg0: i32) -> (i32, i32) {
    %c0_i32 = arith.constant 0 : i32
    %c0_i32_0 = arith.constant 0 : i32
    %c0_i32_1 = arith.constant 0 : i32
    return %c0_i32, %c0_i32_0 : i32, i32
  }
  func.func @transform_3(%arg0: i32) -> (i32, i32) {
    %c0_i32 = arith.constant 0 : i32
    %c0_i32_0 = arith.constant 0 : i32
    %c0_i32_1 = arith.constant 0 : i32
    return %c0_i32, %c0_i32_0 : i32, i32
  }
  func.func @transform_4(%arg0: i32) -> (i32, i32) {
    %c0_i32 = arith.constant 0 : i32
    %c0_i32_0 = arith.constant 0 : i32
    %c0_i32_1 = arith.constant 0 : i32
    return %c0_i32, %c0_i32_0 : i32, i32
  }
  func.func @transform_5(%arg0: i32) -> (i32, i32) {
    %c0_i32 = arith.constant 0 : i32
    %c0_i32_0 = arith.constant 0 : i32
    %c0_i32_1 = arith.constant 0 : i32
    return %c0_i32, %c0_i32_0 : i32, i32
  }
  func.func @transform_6(%arg0: i32) -> (i32, i32) {
    %c0_i32 = arith.constant 0 : i32
    %c0_i32_0 = arith.constant 0 : i32
    %c0_i32_1 = arith.constant 0 : i32
    return %c0_i32, %c0_i32_0 : i32, i32
  }
  func.func @transform_7(%arg0: i32) -> (i32, i32) {
    %c0_i32 = arith.constant 0 : i32
    %c0_i32_0 = arith.constant 0 : i32
    %c0_i32_1 = arith.constant 0 : i32
    return %c0_i32, %c0_i32_0 : i32, i32
  }
  func.func @transform_8(%arg0: i32) -> (i32, i32) {
    %c0_i32 = arith.constant 0 : i32
    %c0_i32_0 = arith.constant 0 : i32
    return %arg0, %c0_i32 : i32, i32
  }
}

</mosaic_0001>

<bundles_post_ra>
// kernel: optimized_ent_model_forward.2
= control target key start
LH: loop header
LB: loop body
LE: loop exit
PB: predicated region body
PF: predicated region fallthrough
CT: control target
= control target key end

     0   :  { %10 = vsyncpa [#allocation4], 0  ;;  %s813_s18 = smov 0   ;;  %s815_s19 = smov 0   ;;  %s933_s0 = inlined_call_operand.vmem [shape: bf16[2,96,32], index: 0, kind: input, shape index: {}]   ;;  %s934_s1 = inlined_call_operand.vmem [shape: bf16[32,32], index: 1, kind: input, shape index: {}]   ;;  %s935_s2 = inlined_call_operand.vmem [shape: f32[1,32], index: 2, kind: input, shape index: {}]   ;;  %s936_s3 = inlined_call_operand.hbm [shape: bf16[32,256], index: 3, kind: input, shape index: {}]   ;;  %s937_s4 = inlined_call_operand.vmem [shape: f32[1,256], index: 4, kind: input, shape index: {}]   ;;  %s938_s5 = inlined_call_operand.vmem [shape: bf16[2,1,256], index: 5, kind: output, shape index: {}]  }
   0x1   :  { %s817_s20 = smov 0   ;;  %s819_s21 = smov 0  }
   0x2   :  { %s821_s22 = smov 0  }
   0x3 LB: > { %s592_s23 = sadd.s32 4294967295, %s773_s22   ;;  %s25_s24 = sadd.s32 1, %s765_s20  ;;  %s773_s22 = sphi %s821_s22, %s16_s22   ;;  %s769_s21 = sphi %s819_s21, %s945_s21   ;;  %s765_s20 = sphi %s817_s20, %s944_s20   ;;  %s761_s19 = sphi %s815_s19, %s943_s19   ;;  %s757_s18 = sphi %s813_s18, %s942_s18  }
   0x4   : > { %p26_p0 = scmp.ge.s32.totalorder %s25_s24, 6  ;;  %s28_s25 = sadd.s32 1, %s769_s21 }
   0x5   : > { %p594_p1 = scmp.ge.s32.totalorder %s773_s22, 1  ;;  %p171_p2 = scmp.lt.s32.totalorder %s773_s22, 13 }
   0x6   : > { %s947_s24 = smov (%p26_p0, %s25_s24), 0  ;;  %s949_s25 = smov (!%p26_p0, %s28_s25), %s769_s21 }
   0x7   : > { %p846_p3 = pnand %p594_p1, %p171_p2  ;;  %p30_p4 = scmp.ge.s32.totalorder %s949_s25, 2 }
   0x8   : > { %p850_p5 = scmp.eq.s32.totalorder %s592_s23, 0  ;;  %s775_s28 = smov [#allocation3]  }
   0x9   : > { %p634_p6 = pneg %p846_p3  ;;  %s951_s25 = smov (%p30_p4, %s949_s25), 0 }
   0xa   : > { %s189_s29 = sshll.u32 %s775_s28, 4  ;;  %s190_s29 = int_to_ptr.vmem [resolvable:$true] %s189_s29 }
   0xb   : > { %p860_p7 = pnand %p850_p5, %p634_p6  ;;  %s716_s6 = scalar_lea.vmem %s190_s29, 512 }
   0xc   : > { %p717_p9 = scmp.ne.s32.totalorder %s190_s29, %s716_s6  ;;  %p724_p12 = scmp.lt.s32.totalorder %s190_s29, %s190_s29 }
   0xd   : > { %p707_p8 = pneg %p860_p7  ;;  %p725_p13 = scmp.lt.s32.totalorder %s716_s6, %s716_s6 }
   0xf   : > { %p719_p10 = pnand %p717_p9, %p707_p8  ;;  %p726_p0 = por %p725_p13, %p724_p12 }
  0x11   : > { %p720_p11 = pneg %p719_p10 }
  0x13   : > { %p727_p1 = pnand %p726_p0, %p720_p11 }
  0x15   : > { %730 = shalt.err (!%p727_p1)
}
  0x16   : > { %s776_s7 = smov 128   ;;  %s777_s8 = smov 8  }
  0x17   : > { %637 = dma.hbm_to_vmem [thread:$0]  (!%p860_p7), %s936_s3, 512, %s190_s29, [#allocation4], %s776_s7, %s776_s7, %s777_s8  }
  0x18   : > { %221 = sbr.rel (%p846_p3) target bundleno = 529 (0x211), region = 40 }
  0x1d   : > { %752 = dma.done.wait (%p850_p5), [#allocation4], 512  }
  0x1e   : > { %754 = vsyncadd (%p850_p5), [#allocation4], 4294966784  ;;  %s599_s11 = sshll.u32 %s757_s18, 1  ;;  %p253_p2 = scmp.lt.s32.totalorder %s761_s19, 1 }
  0x1f   : > { %p255_p4 = scmp.lt.s32.totalorder %s599_s11, 11  ;;  %p602_p3 = scmp.ne.s32.totalorder %s757_s18, 0 }
  0x20   : > { %s953_s19 = smov (!%p253_p2, %s761_s19), 1 }
  0x21   : > { %s955_s11 = smov (!%p255_p4, %s599_s11), 11  ;;  %s629_s12 = smul.u32 12, %s953_s19 }
  0x22   : > { %s601_s13 = sshll.u32 %s953_s19, 1  ;;  %270 = sbr.rel (%p602_p3) target bundleno = 41 (0x29), region = 48 }
  0x23   : > { %s883_s16 = scalar_lea.vmem %s938_s5, %s601_s13  ;;  %s258_s17 = sadd.s32 %s629_s12, %s955_s11 }
  0x24   : > { %s600_s23 = sshll.u32 %s258_s17, 2 }
  0x25   : > { %s260_s28 = scalar_lea.vmem %s933_s0, %s600_s23 }
  0x27   : > { %vm271_vm0 = vcmask 261120   ;;  %v778_v0 = vmov 0.0  }
  0x28   : > { %272 = vst.msk [vmem:[#allocation2] sm:$0xff] %vm271_vm0, %v778_v0 }
  0x29 PF: > { %v688_v1 = vld [vmem:[%s934_s1 + $0x8] sm:$0xff]   ;;  %v779_v2 = vmov 0.0   ;;  %v689_v3 = vld [vmem:[%s934_s1] sm:$0xff]   ;;  %vm780_vm1 = vmmov 0   ;;  %vm303_vm2 = vcmask 261120   ;;  %v358_v14 = vlaneseq  ;;  %s608_s9 = sshll.u32 %s757_s18, 4 }
  0x2a   : > { %621 = vmatprep.subr.bf16.mxu0 %v779_v2  ;;  %625 = vmatprep.mubr.msk.bf16.mxu0 %vm780_vm1, %v779_v2  ;;  %v690_v4 = vld [vmem:[%s260_s28] sm:$0xff]   ;;  %v362_v16 = vstv %s608_s9  ;;  %p609_p5 = scmp.ne.s32.totalorder %s757_s18, 5 }
  0x2b   : > { %622 = vmatpush3.bf16.msra.mxu0 %v688_v1  ;;  %v603_v5 = vld [vmem:[%s935_s2] ss:$0 sm:$0xff]  ;;  %v900_v15 = vshrl.u32 %v358_v14, 7 }
  0x2c   : > { %623 = vmatprep.subr.bf16.mxu0 %v779_v2 }
  0x2d   : > { %v360_v18 = vadd.s32 8, %v900_v15  ;;  %v363_v20 = vadd.s32 %v362_v16, %v900_v15 }
  0x2f   : > { %624 = vmatpush3.bf16.msra.mxu0 %v689_v3  ;;  %v364_v23 = vadd.s32 %v362_v16, %v360_v18  ;;  %vm365_vm3 = vcmp.lt.s32.totalorder %v363_v20, 81  ;;  %v369_v31 = vld [vmem:[#allocation2] sm:$0xff] }
  0x31   : > { %vm366_vm4 = vcmp.lt.s32.totalorder %v364_v23, 81 }
  0x32   : > { %626 = vmatmul.mubr.msk.bf16.vlgmr.msra.gmra.mxu0 %vm303_vm2, %v690_v4 }
  0xf2   : > { %v341_v6 = vpop.f32.mrf.mxu0 }
  0xf3   : > { %v342_v7 = vadd.f32 %v603_v5, %v341_v6 }
  0xf4   : > { %v627_v8 = vpop.f32.mrf.mxu0 }
  0xf5   : > { %v348_v9 = vmul.f32 0.5, %v342_v7 }
  0xf6   : > { %v344_v10 = vpop.f32.mrf.mxu0 }
  0xf7   : > { %691 = vtanh.f32 %v348_v9  ;;  %v345_v11 = vadd.f32 %v603_v5, %v344_v10 }
  0xf8   : > { %v628_v12 = vpop.f32.mrf.mxu0 }
  0xf9   : > { %v349_v13 = vmul.f32 0.5, %v345_v11 }
  0xfb   : > { %693 = vtanh.f32 %v349_v13 }
 0x104   : > { %v692_v17 = vpop.eup %691 }
 0x105   : > { %v352_v19 = vmul.f32 0.5, %v692_v17 }
 0x107   : > { %v354_v21 = vadd.f32 0.5, %v352_v19 }
 0x108   : > { %v694_v22 = vpop.eup %693 }
 0x109   : > { %v356_v24 = vmul.f32 %v354_v21, %v342_v7  ;;  %v353_v25 = vmul.f32 0.5, %v694_v22 }
 0x10b   : > { %v355_v26 = vadd.f32 0.5, %v353_v25  ;;  %v367_v27 = vsel %vm365_vm3, %v356_v24, 0.0 }
 0x10c   : > { %v370_v30 = vsel %vm303_vm2, %v367_v27, 0.0 }
 0x10d   : > { %v357_v28 = vmul.f32 %v355_v26, %v345_v11 }
 0x10f   : > { %v368_v29 = vsel %vm366_vm4, %v357_v28, 0.0 }
 0x110   : > { %v371_v32 = vsel %vm303_vm2, %v368_v29, 0.0 }
 0x111   : > { %v372_v33 = vadd.f32 %v371_v32, %v370_v30  ;;  %378 = sbr.rel (%p609_p5) target bundleno = 529 (0x211), region = 52 }
 0x113   : > { %v373_v34 = vadd.f32 %v372_v33, %v369_v31 }
 0x115   : > { %374 = vst.msk [vmem:[#allocation2] sm:$0xff] %vm303_vm2, %v373_v34 }
 0x116   : > { %v695_v35 = vld [vmem:[#allocation3 + $0x14] ss:$8 sps:$4 sm:$0xff]   ;;  %v697_v36 = vld [vmem:[#allocation3 + $0x10] ss:$8 sps:$4 sm:$0xff]   ;;  %v781_v37 = vmov 0   ;;  %v417_v50 = vsub.s32 0, %v900_v15 }
 0x117   : > { %460 = vmatprep.mubr.bf16.mxu0 %v781_v37  ;;  %440 = vmatprep.subr.bf16.mxu0 %v695_v35  ;;  %v698_v38 = vld [vmem:[#allocation3 + $0x4] ss:$8 sps:$4 sm:$0xff]   ;;  %v700_v40 = vld [vmem:[#allocation3] ss:$8 sps:$4 sm:$0xff]   ;;  %v393_v51 = vld [vmem:[%s937_s4] sm:$0x3] }
 0x118   : > { %441 = vmatpush1.bf16.msra.mxu0 %v697_v36  ;;  %v421_v52 = vsub.s32 1, %v900_v15  ;;  %v418_v53 = vrot.slane %v393_v51, %v417_v50  ;;  %v782_v63 = vmov 1966171168   ;;  %vm499_vm5 = vcmask 1040384   ;;  %v506_v13 = vld [vmem:[%s883_s16] sm:$0x3] }
 0x119   : > { %442 = vmatprep.subr.bf16.mxu0 %v698_v38  ;;  %v485_v0 = vunpack.c.l.s4 %v782_v63  ;;  %vm500_vm6 = vsmask.f32 256  ;;  %vm502_vm7 = vcmask 1041409   ;;  %vm503_vm8 = vsmask.f32 1280 }
 0x11a   : > { %v422_v54 = vrot.slane %v393_v51, %v421_v52  ;;  %vm501_vm9 = vmand %vm499_vm5, %vm500_vm6 }
 0x11b   : > { %v486_v6 = vunpack.c.0.s8 %v485_v0  ;;  %vm504_vm10 = vmand %vm502_vm7, %vm503_vm8 }
 0x11c   : > { %v379_v39 = vld [vmem:[#allocation2] sm:$0xff]  ;;  %443 = vmatpush1.bf16.msra.mxu0 %v700_v40  ;;  %vm505_vm11 = vmor %vm504_vm10, %vm501_vm9 }
 0x11d   : > { %v380_v41 = vsel %vm303_vm2, %v379_v39, 0.0  ;;  %v489_v10 = vsub.s32 %v486_v6, %v900_v15 }
 0x11e   : > { %v381_v42 = vrot.slane %v380_v41, 4 }
 0x120   : > { %v382_v43 = vadd.f32 %v381_v42, %v380_v41 }
 0x122   : > { %v383_v44 = vrot.slane %v382_v43, 2 }
 0x124   : > { %v384_v45 = vadd.f32 %v383_v44, %v382_v43 }
 0x126   : > { %v385_v46 = vrot.slane %v384_v45, 1 }
 0x128   : > { %v386_v47 = vadd.f32 %v385_v46, %v384_v45 }
 0x12a   : > { %v387_v48 = vmul.f32 0.012345679, %v386_v47 }
 0x12c   : > { %v388_v49 = vpack.c.bf16 %v387_v48, %v387_v48 }
 0x12e   : > { %614 = vmatmul.mubr.msk.bf16.vlgmr.msra.gmra.mxu0 %vm303_vm2, %v388_v49 }
 0x1ee   : > { %v462_v55 = vpop.f32.mrf.mxu0 }
 0x1ef   : > { %v463_v56 = vadd.f32 %v462_v55, %v418_v53 }
 0x1f0   : > { %v464_v57 = vpop.f32.mrf.mxu0 }
 0x1f1   : > { %v469_v58 = vmul.f32 0.5, %v463_v56  ;;  %v465_v59 = vadd.f32 %v464_v57, %v422_v54 }
 0x1f2   : > { %v466_v60 = vpop.f32.mrf.mxu0 }
 0x1f3   : > { %701 = vtanh.f32 %v469_v58  ;;  %v470_v61 = vmul.f32 0.5, %v465_v59 }
 0x1f4   : > { %v467_v62 = vpop.f32.mrf.mxu0 }
 0x1f5   : > { %703 = vtanh.f32 %v470_v61 }
 0x200   : > { %v702_v1 = vpop.eup %701 }
 0x201   : > { %v473_v2 = vmul.f32 0.5, %v702_v1 }
 0x202   : > { %v704_v3 = vpop.eup %703 }
 0x203   : > { %v475_v4 = vadd.f32 0.5, %v473_v2  ;;  %v474_v5 = vmul.f32 0.5, %v704_v3 }
 0x205   : > { %v476_v7 = vadd.f32 0.5, %v474_v5  ;;  %v477_v8 = vmul.f32 %v475_v4, %v463_v56 }
 0x207   : > { %v478_v9 = vmul.f32 %v476_v7, %v465_v59 }
 0x209   : > { %v615_v11 = vpack.c.bf16 %v478_v9, %v477_v8 }
 0x20b   : > { %v490_v12 = vrot.slane %v615_v11, %v489_v10 }
 0x20d   : > { %v497_v14 = vrot.slane %v490_v12, %v489_v10 }
 0x20f   : > { %v507_v16 = vsel %vm505_vm11, %v497_v14, %v506_v13 }
 0x210   : > { %508 = vst [vmem:[%s883_s16] sm:$0x3] %v507_v16 }
 0x211 PF: > { %s16_s22 = sadd.s32 1, %s773_s22   ;;  %s942_s18 = smov %s765_s20 }
 0x212   : > { %p13_p6 = scmp.ge.s32.totalorder %s16_s22, 14   ;;  %s943_s19 = smov %s769_s21 }
 0x213   : > { %s944_s20 = smov %s947_s24  ;;  %s945_s21 = smov %s951_s25 }
 0x214   :  { %15 = sbr.rel (!%p13_p6) target bundleno = 3 (0x3), region = 83 }
 0x219   :  { %528 = vsyncpa [#allocation4], 1 }
 0x21a   :  { %530 = vsyncpa [#allocation4 + $0x1], 1 }

// kernel: optimized_ent_model_forward.3
= control target key start
LH: loop header
LB: loop body
LE: loop exit
PB: predicated region body
PF: predicated region fallthrough
CT: control target
= control target key end

     0   :  { %13 = vsyncpa [#allocation3], 0  ;;  %s5903_s0 = inlined_call_operand.vmem [shape: bf16[8,256], index: 0, kind: input, shape index: {}]   ;;  %s5904_s1 = inlined_call_operand.vmem [shape: bf16[256,64], index: 1, kind: input, shape index: {}]   ;;  %s5905_s2 = inlined_call_operand.hbm [shape: bf16[64,256], index: 2, kind: input, shape index: {}]   ;;  %s5906_s3 = inlined_call_operand.vmem [shape: bf16[256,1024], index: 3, kind: input, shape index: {}]   ;;  %s5907_s4 = inlined_call_operand.hbm [shape: bf16[1024,512], index: 4, kind: input, shape index: {}]   ;;  %s5908_s5 = inlined_call_operand.vmem [shape: bf16[512,256], index: 5, kind: input, shape index: {}]   ;;  %s5909_s6 = inlined_call_operand.vmem [shape: bf16[256,128], index: 6, kind: input, shape index: {}]   ;;  %s5910_s7 = inlined_call_operand.hbm [shape: f32[8,1024], index: 7, kind: input, shape index: {}]   ;;  %s5911_s8 = inlined_call_operand.vmem [shape: f32[8,128], index: 8, kind: output, shape index: {}]  }
   0x1   :  { %14 = vsyncpa [#allocation5], 0  ;;  %s5053_s27 = smov [#allocation4]  }
   0x2   :  { %s38_s28 = sshll.u32 %s5053_s27, 4  ;;  %s39_s28 = int_to_ptr.vmem [resolvable:$true] %s38_s28 }
   0x3   :  { %s4997_s29 = scalar_lea.vmem %s39_s28, 32768  ;;  %p5002_p1 = scmp.lt.s32.totalorder %s39_s28, %s39_s28 }
   0x4   :  { %p4998_p0 = scmp.ne.s32.totalorder %s39_s28, %s4997_s29  ;;  %p5003_p2 = scmp.lt.s32.totalorder %s4997_s29, %s4997_s29 }
   0x6   :  { %p5004_p3 = por %p5003_p2, %p5002_p1 }
   0x8   :  { %p5005_p4 = pnand %p5004_p3, %p4998_p0 }
   0xa   :  { %5008 = shalt.err (!%p5005_p4)
}
   0xb   :  { %s5054_s30 = smov 256   ;;  %s5055_s9 = smov 16  }
   0xc   :  { %44 = dma.hbm_to_vmem [thread:$0]  %s5907_s4, 32768, %s39_s28, [#allocation5], %s5054_s30, %s5054_s30, %s5055_s9  }
   0xd   :  { %s5056_s12 = smov [#allocation2]  }
   0xe   :  { %s24_s13 = sshll.u32 %s5056_s12, 4  ;;  %s25_s13 = int_to_ptr.vmem [resolvable:$true] %s24_s13 }
   0xf   :  { %s5017_s14 = scalar_lea.vmem %s25_s13, 1024  ;;  %p5022_p6 = scmp.lt.s32.totalorder %s25_s13, %s25_s13 }
  0x10   :  { %p5018_p5 = scmp.ne.s32.totalorder %s25_s13, %s5017_s14  ;;  %p5023_p7 = scmp.lt.s32.totalorder %s5017_s14, %s5017_s14 }
  0x12   :  { %p5024_p8 = por %p5023_p7, %p5022_p6 }
  0x14   :  { %p5025_p9 = pnand %p5024_p8, %p5018_p5 }
  0x16   :  { %5028 = shalt.err (!%p5025_p9)
}
  0x17   :  { %s5057_s15 = smov 128   ;;  %s5058_s16 = smov 8  }
  0x18   :  { %30 = dma.hbm_to_vmem [thread:$0]  %s5905_s2, 1024, %s25_s13, [#allocation3], %s5057_s15, %s5057_s15, %s5058_s16  }
  0x19   :  { %s5059_s19 = smov [#allocation6]  }
  0x1a   :  { %s55_s20 = sshll.u32 %s5059_s19, 4  ;;  %s56_s20 = int_to_ptr.vmem [resolvable:$true] %s55_s20 }
  0x1b   :  { %s5037_s4 = scalar_lea.vmem %s56_s20, 1024  ;;  %p5042_p11 = scmp.lt.s32.totalorder %s56_s20, %s56_s20 }
  0x1c   :  { %p5038_p10 = scmp.ne.s32.totalorder %s56_s20, %s5037_s4  ;;  %p5043_p12 = scmp.lt.s32.totalorder %s5037_s4, %s5037_s4 }
  0x1e   :  { %p5044_p13 = por %p5043_p12, %p5042_p11 }
  0x20   :  { %p5045_p0 = pnand %p5044_p13, %p5038_p10 }
  0x22   :  { %5048 = shalt.err (!%p5045_p0)
}
  0x23   :  { %58 = dma.hbm_to_vmem [thread:$0]  %s5910_s7, 1024, %s56_s20, [#allocation5]  }
  0x24   :  { %5049 = dma.done.wait [#allocation3], 1024  }
  0x25   :  { %5050 = vsyncadd [#allocation3], 4294966272 }
  0x26   :  { %5051 = dma.done.wait [#allocation5], 33792  }
  0x27   :  { %5052 = vsyncadd [#allocation5], 4294933504  ;;  %v4458_v0 = vld [vmem:[%s5904_s1 + $0x78] sm:$0xff]   ;;  %v4460_v2 = vld [vmem:[%s5904_s1 + $0x70] sm:$0xff]   ;;  %v5060_v27 = vmov 0   ;;  %vm311_vm0 = vcmask 523264  }
  0x28   :  { %v4459_v1 = vld [vmem:[%s5904_s1 + $0x38] sm:$0xff]   ;;  %4406 = vmatprep.subr.bf16.mxu0 %v4458_v0  ;;  %v4461_v3 = vld [vmem:[%s5904_s1 + $0x30] sm:$0xff]   ;;  %v4462_v4 = vld [vmem:[%s5904_s1 + $0x68] sm:$0xff]   ;;  %347 = vmatprep.mubr.bf16.mxu1 %v5060_v27 }
  0x29   :  { %4407 = vmatpush3.bf16.msra.mxu0 %v4459_v1  ;;  %v4463_v5 = vld [vmem:[%s5904_s1 + $0x28] sm:$0xff]   ;;  %v4464_v6 = vld [vmem:[%s5904_s1 + $0x60] sm:$0xff]   ;;  %v4466_v8 = vld [vmem:[%s5904_s1 + $0x58] sm:$0xff]  }
  0x2a   :  { %4408 = vmatprep.subr.bf16.mxu0 %v4460_v2  ;;  %v4465_v7 = vld [vmem:[%s5904_s1 + $0x20] sm:$0xff]   ;;  %v4467_v9 = vld [vmem:[%s5904_s1 + $0x18] sm:$0xff]   ;;  %v4468_v10 = vld [vmem:[%s5904_s1 + $0x50] sm:$0xff]  }
  0x2b   :  { %v69_v11 = vld [vmem:[%s5903_s0] sm:$0xff]  ;;  %v4469_v12 = vld [vmem:[%s5904_s1 + $0x10] sm:$0xff]   ;;  %v4470_v16 = vld [vmem:[%s5904_s1 + $0x48] sm:$0xff]  }
  0x2c   :  { %v3916_v13 = vcombine.high %v69_v11, %v69_v11  ;;  %v4476_v14 = vld [vmem:[#allocation2 + $0x34] ss:$8 sps:$4 sm:$0xff]   ;;  %v4478_v15 = vld [vmem:[#allocation2 + $0x30] ss:$8 sps:$4 sm:$0xff]   ;;  %v4479_v17 = vld [vmem:[#allocation2 + $0x24] ss:$8 sps:$4 sm:$0xff]   ;;  %v3915_v21 = vcombine.low %v69_v11, %v69_v11 }
  0x2d   :  { %4409 = vmatpush3.bf16.msra.mxu0 %v4461_v3  ;;  %323 = vmatprep.subr.bf16.mxu1 %v4476_v14  ;;  %v4471_v18 = vld [vmem:[%s5904_s1 + $0x8] sm:$0xff]   ;;  %v4472_v19 = vld [vmem:[%s5904_s1 + $0x40] sm:$0xff]   ;;  %v4482_v23 = vld [vmem:[#allocation2 + $0x14] ss:$8 sps:$4 sm:$0xff]  }
  0x2e   :  { %4410 = vmatprep.subr.bf16.mxu0 %v4462_v4  ;;  %240 = vmatprep.mubr.bf16.mxu0 %v3916_v13  ;;  %v4473_v20 = vld [vmem:[%s5904_s1] sm:$0xff]   ;;  %v4484_v24 = vld [vmem:[#allocation2 + $0x10] ss:$8 sps:$4 sm:$0xff]   ;;  %v425_v30 = vld [vmem:[%s5906_s3 + $0x1c8] sm:$0xff] }
  0x2f   :  { %324 = vmatpush1.bf16.msra.mxu1 %v4478_v15  ;;  %v4481_v22 = vld [vmem:[#allocation2 + $0x20] ss:$8 sps:$4 sm:$0xff]   ;;  %v4485_v25 = vld [vmem:[#allocation2 + $0x4] ss:$8 sps:$4 sm:$0xff]  }
  0x30   :  { %325 = vmatprep.subr.bf16.mxu1 %v4479_v17  ;;  %v4487_v26 = vld [vmem:[#allocation2] ss:$8 sps:$4 sm:$0xff]  }
  0x31   :  { %4411 = vmatpush3.bf16.msra.mxu0 %v4463_v5  ;;  %v5169_v28 = vld [vmem:[%s5906_s3 + $0x1c0] sm:$0xff]  ;;  %v429_v33 = vld [vmem:[%s5906_s3 + $0x1e8] sm:$0xff] }
  0x32   :  { %4412 = vmatprep.subr.bf16.mxu0 %v4464_v6  ;;  %v5174_v29 = vld [vmem:[%s5906_s3 + $0x1e0] sm:$0xff]  ;;  %v4000_v34 = vcombine.low %v425_v30, %v429_v33  ;;  %v4001_v35 = vcombine.high %v425_v30, %v429_v33  ;;  %v417_v36 = vld [vmem:[%s5906_s3 + $0x188] sm:$0xff] }
  0x33   :  { %326 = vmatpush1.bf16.msra.mxu1 %v4481_v22  ;;  %v3998_v31 = vcombine.low %v5169_v28, %v5174_v29  ;;  %v3999_v32 = vcombine.high %v5169_v28, %v5174_v29  ;;  %v421_v37 = vld [vmem:[%s5906_s3 + $0x1a8] sm:$0xff]  ;;  %v104_v5 = vld [vmem:[#allocation6] ss:$0 sm:$0xff] }
  0x34   :  { %327 = vmatprep.subr.bf16.mxu1 %v4482_v23  ;;  %v3993_v38 = vcombine.high %v417_v36, %v421_v37  ;;  %v3992_v39 = vcombine.low %v417_v36, %v421_v37  ;;  %v409_v40 = vld [vmem:[%s5906_s3 + $0x148] sm:$0xff]  ;;  %v416_v11 = vld [vmem:[%s5906_s3 + $0x180] sm:$0xff] }
  0x35   :  { %4413 = vmatpush3.bf16.msra.mxu0 %v4465_v7  ;;  %v413_v41 = vld [vmem:[%s5906_s3 + $0x168] sm:$0xff]  ;;  %v412_v17 = vld [vmem:[%s5906_s3 + $0x160] sm:$0xff] }
  0x36   :  { %4414 = vmatprep.subr.bf16.mxu0 %v4466_v8  ;;  %v3985_v42 = vcombine.high %v409_v40, %v413_v41  ;;  %v3984_v43 = vcombine.low %v409_v40, %v413_v41  ;;  %v401_v44 = vld [vmem:[%s5906_s3 + $0x108] sm:$0xff]  ;;  %v384_v28 = vld [vmem:[%s5906_s3 + $0x80] sm:$0xff] }
  0x37   :  { %328 = vmatpush1.bf16.msra.mxu1 %v4484_v24  ;;  %v405_v45 = vld [vmem:[%s5906_s3 + $0x128] sm:$0xff]  ;;  %v392_v24 = vld [vmem:[%s5906_s3 + $0xc0] sm:$0xff] }
  0x38   :  { %329 = vmatprep.subr.bf16.mxu1 %v4485_v25  ;;  %v3977_v46 = vcombine.high %v401_v44, %v405_v45  ;;  %v3976_v47 = vcombine.low %v401_v44, %v405_v45  ;;  %v393_v48 = vld [vmem:[%s5906_s3 + $0xc8] sm:$0xff]  ;;  %v396_v25 = vld [vmem:[%s5906_s3 + $0xe0] sm:$0xff] }
  0x39   :  { %4415 = vmatpush3.bf16.msra.mxu0 %v4467_v9  ;;  %v397_v49 = vld [vmem:[%s5906_s3 + $0xe8] sm:$0xff]  ;;  %v3967_v27 = vcombine.high %v392_v24, %v396_v25  ;;  %v388_v29 = vld [vmem:[%s5906_s3 + $0xa0] sm:$0xff]  ;;  %v3966_v30 = vcombine.low %v392_v24, %v396_v25 }
  0x3a   :  { %4416 = vmatprep.subr.bf16.mxu0 %v4468_v10  ;;  %v3969_v50 = vcombine.high %v393_v48, %v397_v49  ;;  %v3968_v51 = vcombine.low %v393_v48, %v397_v49  ;;  %v385_v52 = vld [vmem:[%s5906_s3 + $0x88] sm:$0xff]  ;;  %v380_v33 = vld [vmem:[%s5906_s3 + $0x60] sm:$0xff] }
  0x3b   :  { %330 = vmatpush1.bf16.msra.mxu1 %v4487_v26  ;;  %v389_v53 = vld [vmem:[%s5906_s3 + $0xa8] sm:$0xff]  ;;  %v368_v36 = vld [vmem:[%s5906_s3] sm:$0xff] }
  0x3c   :  { %1181 = vmatprep.subr.bf16.mxu1 %v3999_v32  ;;  %v3961_v54 = vcombine.high %v385_v52, %v389_v53  ;;  %v3960_v55 = vcombine.low %v385_v52, %v389_v53  ;;  %v377_v56 = vld [vmem:[%s5906_s3 + $0x48] sm:$0xff]  ;;  %v376_v32 = vld [vmem:[%s5906_s3 + $0x40] sm:$0xff] }
  0x3d   :  { %4417 = vmatpush3.bf16.msra.mxu0 %v4469_v12  ;;  %v381_v57 = vld [vmem:[%s5906_s3 + $0x68] sm:$0xff]  ;;  %v420_v12 = vld [vmem:[%s5906_s3 + $0x1a0] sm:$0xff] }
  0x3e   :  { %4418 = vmatprep.subr.bf16.mxu0 %v4470_v16  ;;  %v3953_v58 = vcombine.high %v377_v56, %v381_v57  ;;  %v3952_v59 = vcombine.low %v377_v56, %v381_v57  ;;  %v369_v60 = vld [vmem:[%s5906_s3 + $0x8] sm:$0xff]  ;;  %v3991_v15 = vcombine.high %v416_v11, %v420_v12  ;;  %v408_v16 = vld [vmem:[%s5906_s3 + $0x140] sm:$0xff] }
  0x3f   :  { %v373_v61 = vld [vmem:[%s5906_s3 + $0x28] sm:$0xff]  ;;  %v3982_v22 = vcombine.low %v408_v16, %v412_v17  ;;  %v372_v37 = vld [vmem:[%s5906_s3 + $0x20] sm:$0xff] }
  0x40   :  { %v3945_v62 = vcombine.high %v369_v60, %v373_v61  ;;  %v3944_v63 = vcombine.low %v369_v60, %v373_v61  ;;  %v489_v0 = vld [vmem:[%s5906_s3 + $0x3c8] sm:$0xff]  ;;  %v488_v40 = vld [vmem:[%s5906_s3 + $0x3c0] sm:$0xff] }
  0x41   :  { %4419 = vmatpush3.bf16.msra.mxu0 %v4471_v18  ;;  %v493_v1 = vld [vmem:[%s5906_s3 + $0x3e8] sm:$0xff]  ;;  %v3990_v18 = vcombine.low %v416_v11, %v420_v12  ;;  %v492_v41 = vld [vmem:[%s5906_s3 + $0x3e0] sm:$0xff] }
  0x42   :  { %4420 = vmatprep.subr.bf16.mxu0 %v4472_v19  ;;  %v4065_v2 = vcombine.high %v489_v0, %v493_v1  ;;  %v4064_v3 = vcombine.low %v489_v0, %v493_v1  ;;  %v3983_v19 = vcombine.high %v408_v16, %v412_v17  ;;  %v4062_v44 = vcombine.low %v488_v40, %v492_v41  ;;  %v480_v45 = vld [vmem:[%s5906_s3 + $0x380] sm:$0xff]  ;;  %v485_v49 = vld [vmem:[%s5906_s3 + $0x3a8] sm:$0xff] }
  0x43   :  { %v472_v53 = vld [vmem:[%s5906_s3 + $0x340] sm:$0xff]  ;;  %v477_v57 = vld [vmem:[%s5906_s3 + $0x368] sm:$0xff] }
  0x44   :  { %v464_v61 = vld [vmem:[%s5906_s3 + $0x300] sm:$0xff]  ;;  %v469_v1 = vld [vmem:[%s5906_s3 + $0x328] sm:$0xff] }
  0x45   :  { %4421 = vmatpush3.bf16.msra.mxu0 %v4473_v20  ;;  %v400_v20 = vld [vmem:[%s5906_s3 + $0x100] sm:$0xff]  ;;  %v453_v17 = vld [vmem:[%s5906_s3 + $0x2a8] sm:$0xff] }
  0x46   :  { %1222 = vmatprep.subr.bf16.mxu0 %v4001_v35  ;;  %v3951_v35 = vcombine.high %v376_v32, %v380_v33  ;;  %v445_v25 = vld [vmem:[%s5906_s3 + $0x268] sm:$0xff] }
  0x48   :  { %241 = vmatmul.mubr.bf16.vlgmr.msra.gmra.mxu0 %v3915_v21  ;;  %v404_v21 = vld [vmem:[%s5906_s3 + $0x120] sm:$0xff] }
  0x49   :  { %1223 = vmatpush1.bf16.msra.mxu0 %v4000_v34  ;;  %v3975_v23 = vcombine.high %v400_v20, %v404_v21  ;;  %v3974_v26 = vcombine.low %v400_v20, %v404_v21  ;;  %v3958_v34 = vcombine.low %v384_v28, %v388_v29  ;;  %v440_v21 = vld [vmem:[%s5906_s3 + $0x240] sm:$0xff] }
  0x4a   :  { %1224 = vmatprep.subr.bf16.mxu0 %v3993_v38  ;;  %v3950_v38 = vcombine.low %v376_v32, %v380_v33  ;;  %v437_v33 = vld [vmem:[%s5906_s3 + $0x228] sm:$0xff] }
  0x4d   :  { %1225 = vmatpush1.bf16.msra.mxu0 %v3992_v39  ;;  %v3943_v39 = vcombine.high %v368_v36, %v372_v37 }
  0x4e   :  { %1226 = vmatprep.subr.bf16.mxu0 %v3985_v42  ;;  %v3942_v42 = vcombine.low %v368_v36, %v372_v37  ;;  %v426_v37 = vld [vmem:[%s5906_s3 + $0x1d0] sm:$0xff] }
  0x51   :  { %1227 = vmatpush1.bf16.msra.mxu0 %v3984_v43  ;;  %v4063_v43 = vcombine.high %v488_v40, %v492_v41  ;;  %v431_v41 = vld [vmem:[%s5906_s3 + $0x1f8] sm:$0xff] }
  0x52   :  { %1228 = vmatprep.subr.bf16.mxu0 %v3977_v46  ;;  %v484_v46 = vld [vmem:[%s5906_s3 + $0x3a0] sm:$0xff] }
  0x53   :  { %v4055_v48 = vcombine.high %v480_v45, %v484_v46 }
  0x55   :  { %1229 = vmatpush1.bf16.msra.mxu0 %v3976_v47  ;;  %v481_v47 = vld [vmem:[%s5906_s3 + $0x388] sm:$0xff] }
  0x56   :  { %1230 = vmatprep.subr.bf16.mxu0 %v3969_v50  ;;  %v4054_v50 = vcombine.low %v480_v45, %v484_v46  ;;  %v4057_v52 = vcombine.high %v481_v47, %v485_v49  ;;  %v261_v45 = vlaneseq }
  0x58   :  { %v5381_v46 = vshrl.u32 %v261_v45, 7 }
  0x59   :  { %1231 = vmatpush1.bf16.msra.mxu0 %v3968_v51  ;;  %v4056_v51 = vcombine.low %v481_v47, %v485_v49 }
  0x5a   :  { %1232 = vmatprep.subr.bf16.mxu0 %v3961_v54  ;;  %v476_v54 = vld [vmem:[%s5906_s3 + $0x360] sm:$0xff]  ;;  %v5384_v47 = vsub.s32 0, %v5381_v46  ;;  %v5387_v49 = vsub.s32 1, %v5381_v46 }
  0x5b   :  { %v4047_v56 = vcombine.high %v472_v53, %v476_v54 }
  0x5d   :  { %1233 = vmatpush1.bf16.msra.mxu0 %v3960_v55  ;;  %v473_v55 = vld [vmem:[%s5906_s3 + $0x348] sm:$0xff] }
  0x5e   :  { %1234 = vmatprep.subr.bf16.mxu0 %v3953_v58  ;;  %v4046_v58 = vcombine.low %v472_v53, %v476_v54  ;;  %v4049_v60 = vcombine.high %v473_v55, %v477_v57 }
  0x61   :  { %1235 = vmatpush1.bf16.msra.mxu0 %v3952_v59  ;;  %v4048_v59 = vcombine.low %v473_v55, %v477_v57 }
  0x62   :  { %1236 = vmatprep.subr.bf16.mxu0 %v3945_v62  ;;  %v468_v62 = vld [vmem:[%s5906_s3 + $0x320] sm:$0xff] }
  0x63   :  { %v4039_v0 = vcombine.high %v464_v61, %v468_v62 }
  0x65   :  { %1237 = vmatpush1.bf16.msra.mxu0 %v3944_v63  ;;  %v465_v63 = vld [vmem:[%s5906_s3 + $0x308] sm:$0xff] }
  0x66   :  { %1238 = vmatprep.subr.bf16.mxu0 %v4065_v2  ;;  %v4038_v2 = vcombine.low %v464_v61, %v468_v62 }
  0x69   :  { %1239 = vmatpush2.bf16.msra.mxu0 %v4064_v3  ;;  %v4040_v3 = vcombine.low %v465_v63, %v469_v1 }
  0x6a   :  { %1240 = vmatprep.subr.bf16.mxu0 %v4057_v52 }
  0x6d   :  { %1241 = vmatpush2.bf16.msra.mxu0 %v4056_v51 }
  0x6e   :  { %1242 = vmatprep.subr.bf16.mxu0 %v4049_v60 }
  0x71   :  { %1243 = vmatpush2.bf16.msra.mxu0 %v4048_v59 }
 0x108   :  { %v4422_v4 = vpop.f32.mrf.mxu0 }
 0x10a   :  { %v4423_v6 = vpop.f32.mrf.mxu0 }
 0x10b   :  { %v4424_v7 = vadd.f32 %v4423_v6, %v4422_v4  ;;  %v4041_v4 = vcombine.high %v465_v63, %v469_v1  ;;  %v460_v6 = vld [vmem:[%s5906_s3 + $0x2e0] sm:$0xff] }
 0x10c   :  { %v4425_v8 = vpop.f32.mrf.mxu0  ;;  %v4988_v63 = vld [vmem:[%s5903_s0] sm:$0xff] }
 0x10d   :  { %v243_v9 = vadd.f32 %v4424_v7, %v104_v5  ;;  %1244 = vmatprep.subr.bf16.mxu0 %v4041_v4  ;;  %v456_v5 = vld [vmem:[%s5906_s3 + $0x2c0] sm:$0xff]  ;;  %v457_v7 = vld [vmem:[%s5906_s3 + $0x2c8] sm:$0xff]  ;;  %v71_v1 = vunpack.c.h.bf16 %v4988_v63 }
 0x10e   :  { %v4426_v10 = vpop.f32.mrf.mxu0  ;;  %1245 = vmatpush2.bf16.msra.mxu0 %v4040_v3  ;;  %v4031_v8 = vcombine.high %v456_v5, %v460_v6 }
 0x10f   :  { %v248_v13 = vmax.f32 %v243_v9, 0.0  ;;  %v461_v9 = vld [vmem:[%s5906_s3 + $0x2e8] sm:$0xff]  ;;  %v4030_v10 = vcombine.low %v456_v5, %v460_v6 }
 0x110   :  { %v4032_v11 = vcombine.low %v457_v7, %v461_v9  ;;  %v4033_v12 = vcombine.high %v457_v7, %v461_v9  ;;  %v418_v7 = vld [vmem:[%s5906_s3 + $0x190] sm:$0xff]  ;;  %v419_v9 = vld [vmem:[%s5906_s3 + $0x198] sm:$0xff] }
 0x111   :  { %v249_v14 = vpack.c.bf16 %v248_v13, %v248_v13  ;;  %v448_v13 = vld [vmem:[%s5906_s3 + $0x280] sm:$0xff] }
 0x112   :  { %1246 = vmatprep.subr.bf16.mxu0 %v4033_v12 }
 0x113   :  { %3941 = vmatmul.mubr.msk.bf16.vlgmr.msra.gmra.mxu1 %vm311_vm0, %v249_v14  ;;  %v452_v14 = vld [vmem:[%s5906_s3 + $0x2a0] sm:$0xff]  ;;  %1247 = vmatpush2.bf16.msra.mxu0 %v4032_v11 }
 0x114   :  { %1182 = vmatpush1.bf16.msra.mxu1 %v3998_v31  ;;  %v3959_v31 = vcombine.high %v384_v28, %v388_v29  ;;  %v4023_v16 = vcombine.high %v448_v13, %v452_v14  ;;  %v432_v29 = vld [vmem:[%s5906_s3 + $0x200] sm:$0xff] }
 0x115   :  { %1183 = vmatprep.subr.bf16.mxu1 %v3991_v15  ;;  %v449_v15 = vld [vmem:[%s5906_s3 + $0x288] sm:$0xff] }
 0x116   :  { %v4025_v20 = vcombine.high %v449_v15, %v453_v17 }
 0x118   :  { %1184 = vmatpush1.bf16.msra.mxu1 %v3990_v18  ;;  %v4022_v18 = vcombine.low %v448_v13, %v452_v14  ;;  %1248 = vmatprep.subr.bf16.mxu0 %v4025_v20  ;;  %v410_v13 = vld [vmem:[%s5906_s3 + $0x150] sm:$0xff] }
 0x119   :  { %1185 = vmatprep.subr.bf16.mxu1 %v3983_v19  ;;  %v4024_v19 = vcombine.low %v449_v15, %v453_v17  ;;  %v411_v17 = vld [vmem:[%s5906_s3 + $0x158] sm:$0xff] }
 0x11b   :  { %1249 = vmatpush2.bf16.msra.mxu0 %v4024_v19 }
 0x11c   :  { %1186 = vmatpush1.bf16.msra.mxu1 %v3982_v22  ;;  %v444_v22 = vld [vmem:[%s5906_s3 + $0x260] sm:$0xff] }
 0x11d   :  { %1187 = vmatprep.subr.bf16.mxu1 %v3975_v23  ;;  %v441_v23 = vld [vmem:[%s5906_s3 + $0x248] sm:$0xff]  ;;  %v4015_v24 = vcombine.high %v440_v21, %v444_v22 }
 0x11e   :  { %v4017_v28 = vcombine.high %v441_v23, %v445_v25 }
 0x120   :  { %1188 = vmatpush1.bf16.msra.mxu1 %v3974_v26  ;;  %v4014_v26 = vcombine.low %v440_v21, %v444_v22  ;;  %1250 = vmatprep.subr.bf16.mxu0 %v4017_v28 }
 0x121   :  { %1189 = vmatprep.subr.bf16.mxu1 %v3967_v27  ;;  %v4016_v27 = vcombine.low %v441_v23, %v445_v25  ;;  %v402_v23 = vld [vmem:[%s5906_s3 + $0x110] sm:$0xff]  ;;  %v403_v25 = vld [vmem:[%s5906_s3 + $0x118] sm:$0xff] }
 0x123   :  { %1251 = vmatpush2.bf16.msra.mxu0 %v4016_v27 }
 0x124   :  { %1190 = vmatpush1.bf16.msra.mxu1 %v3966_v30  ;;  %v436_v30 = vld [vmem:[%s5906_s3 + $0x220] sm:$0xff] }
 0x125   :  { %1191 = vmatprep.subr.bf16.mxu1 %v3959_v31  ;;  %v433_v31 = vld [vmem:[%s5906_s3 + $0x208] sm:$0xff]  ;;  %v4007_v32 = vcombine.high %v432_v29, %v436_v30 }
 0x126   :  { %v4009_v36 = vcombine.high %v433_v31, %v437_v33 }
 0x128   :  { %1192 = vmatpush1.bf16.msra.mxu1 %v3958_v34  ;;  %v4006_v34 = vcombine.low %v432_v29, %v436_v30  ;;  %1252 = vmatprep.subr.bf16.mxu0 %v4009_v36 }
 0x129   :  { %1193 = vmatprep.subr.bf16.mxu1 %v3951_v35  ;;  %v4008_v35 = vcombine.low %v433_v31, %v437_v33  ;;  %v394_v31 = vld [vmem:[%s5906_s3 + $0xd0] sm:$0xff]  ;;  %v395_v33 = vld [vmem:[%s5906_s3 + $0xd8] sm:$0xff] }
 0x12b   :  { %1253 = vmatpush2.bf16.msra.mxu0 %v4008_v35 }
 0x12c   :  { %1194 = vmatpush1.bf16.msra.mxu1 %v3950_v38  ;;  %v430_v38 = vld [vmem:[%s5906_s3 + $0x1f0] sm:$0xff] }
 0x12d   :  { %1195 = vmatprep.subr.bf16.mxu1 %v3943_v39  ;;  %v427_v39 = vld [vmem:[%s5906_s3 + $0x1d8] sm:$0xff]  ;;  %v4003_v40 = vcombine.high %v426_v37, %v430_v38 }
 0x130   :  { %1196 = vmatpush1.bf16.msra.mxu1 %v3942_v42  ;;  %v4002_v42 = vcombine.low %v426_v37, %v430_v38 }
 0x131   :  { %1197 = vmatprep.subr.bf16.mxu1 %v4063_v43  ;;  %v4004_v43 = vcombine.low %v427_v39, %v431_v41 }
 0x134   :  { %1198 = vmatpush2.bf16.msra.mxu1 %v4062_v44  ;;  %v4005_v44 = vcombine.high %v427_v39, %v431_v41  ;;  %v386_v39 = vld [vmem:[%s5906_s3 + $0x90] sm:$0xff]  ;;  %v387_v41 = vld [vmem:[%s5906_s3 + $0x98] sm:$0xff] }
 0x135   :  { %1199 = vmatprep.subr.bf16.mxu1 %v4055_v48  ;;  %v259_v48 = vld [vmem:[#allocation6 + $0x1] ss:$8 sm:$0x3] }
 0x136   :  { %1304 = vmatprep.subr.bf16.mxu0 %v4005_v44  ;;  %v268_v51 = vrot.slane %v259_v48, %v5387_v49 }
 0x138   :  { %1200 = vmatpush2.bf16.msra.mxu1 %v4054_v50  ;;  %v264_v50 = vrot.slane %v259_v48, %v5384_v47 }
 0x139   :  { %1201 = vmatprep.subr.bf16.mxu1 %v4047_v56 }
 0x13c   :  { %1202 = vmatpush2.bf16.msra.mxu1 %v4046_v58 }
 0x13d   :  { %1203 = vmatprep.subr.bf16.mxu1 %v4039_v0  ;;  %v70_v0 = vunpack.c.l.bf16 %v4988_v63 }
 0x140   :  { %1204 = vmatpush2.bf16.msra.mxu1 %v4038_v2 }
 0x141   :  { %1205 = vmatprep.subr.bf16.mxu1 %v4031_v8  ;;  %v422_v8 = vld [vmem:[%s5906_s3 + $0x1b0] sm:$0xff] }
 0x142   :  { %v3995_v14 = vcombine.high %v418_v7, %v422_v8  ;;  %v3994_v19 = vcombine.low %v418_v7, %v422_v8 }
 0x144   :  { %1206 = vmatpush2.bf16.msra.mxu1 %v4030_v10  ;;  %v423_v10 = vld [vmem:[%s5906_s3 + $0x1b8] sm:$0xff] }
 0x145   :  { %1207 = vmatprep.subr.bf16.mxu1 %v4023_v16  ;;  %v3997_v15 = vcombine.high %v419_v9, %v423_v10  ;;  %v414_v16 = vld [vmem:[%s5906_s3 + $0x170] sm:$0xff]  ;;  %v3996_v20 = vcombine.low %v419_v9, %v423_v10 }
 0x146   :  { %v3987_v21 = vcombine.high %v410_v13, %v414_v16  ;;  %v3986_v27 = vcombine.low %v410_v13, %v414_v16  ;;  %v482_v10 = vld [vmem:[%s5906_s3 + $0x390] sm:$0xff]  ;;  %v483_v13 = vld [vmem:[%s5906_s3 + $0x398] sm:$0xff] }
 0x148   :  { %1208 = vmatpush2.bf16.msra.mxu1 %v4022_v18  ;;  %v415_v18 = vld [vmem:[%s5906_s3 + $0x178] sm:$0xff] }
 0x149   :  { %1209 = vmatprep.subr.bf16.mxu1 %v4015_v24  ;;  %v3989_v22 = vcombine.high %v411_v17, %v415_v18  ;;  %v406_v24 = vld [vmem:[%s5906_s3 + $0x130] sm:$0xff]  ;;  %v3988_v28 = vcombine.low %v411_v17, %v415_v18 }
 0x14a   :  { %v3979_v29 = vcombine.high %v402_v23, %v406_v24  ;;  %v3978_v35 = vcombine.low %v402_v23, %v406_v24 }
 0x14c   :  { %1210 = vmatpush2.bf16.msra.mxu1 %v4014_v26  ;;  %v407_v26 = vld [vmem:[%s5906_s3 + $0x138] sm:$0xff] }
 0x14d   :  { %1211 = vmatprep.subr.bf16.mxu1 %v4007_v32  ;;  %v3981_v30 = vcombine.high %v403_v25, %v407_v26  ;;  %v398_v32 = vld [vmem:[%s5906_s3 + $0xf0] sm:$0xff]  ;;  %v3980_v36 = vcombine.low %v403_v25, %v407_v26 }
 0x14e   :  { %v3971_v37 = vcombine.high %v394_v31, %v398_v32 }
 0x150   :  { %1212 = vmatpush2.bf16.msra.mxu1 %v4006_v34  ;;  %v399_v34 = vld [vmem:[%s5906_s3 + $0xf8] sm:$0xff] }
 0x151   :  { %1263 = vmatprep.subr.bf16.mxu1 %v4003_v40  ;;  %v3973_v38 = vcombine.high %v395_v33, %v399_v34  ;;  %v390_v40 = vld [vmem:[%s5906_s3 + $0xb0] sm:$0xff]  ;;  %v3972_v44 = vcombine.low %v395_v33, %v399_v34 }
 0x152   :  { %v3963_v45 = vcombine.high %v386_v39, %v390_v40 }
 0x1d3   :  { %v349_v52 = vpop.f32.mrf.mxu1 }
 0x1d4   :  { %v350_v53 = vadd.f32 %v349_v52, %v264_v50  ;;  %v378_v50 = vld [vmem:[%s5906_s3 + $0x50] sm:$0xff]  ;;  %v379_v52 = vld [vmem:[%s5906_s3 + $0x58] sm:$0xff] }
 0x1d5   :  { %v351_v54 = vpop.f32.mrf.mxu1 }
 0x1d6   :  { %v356_v55 = vmul.f32 0.5, %v350_v53  ;;  %v352_v56 = vadd.f32 %v351_v54, %v268_v51  ;;  %v382_v51 = vld [vmem:[%s5906_s3 + $0x70] sm:$0xff]  ;;  %v383_v53 = vld [vmem:[%s5906_s3 + $0x78] sm:$0xff]  ;;  %v3962_v54 = vcombine.low %v386_v39, %v390_v40 }
 0x1d7   :  { %v353_v57 = vpop.f32.mrf.mxu1  ;;  %v3956_v63 = vcombine.low %v379_v52, %v383_v53 }
 0x1d8   :  { %4984 = vtanh.f32 %v356_v55  ;;  %v357_v58 = vmul.f32 0.5, %v352_v56  ;;  %v3955_v56 = vcombine.high %v378_v50, %v382_v51  ;;  %v3957_v57 = vcombine.high %v379_v52, %v383_v53 }
 0x1d9   :  { %v354_v59 = vpop.f32.mrf.mxu1 }
 0x1da   :  { %4986 = vtanh.f32 %v357_v58  ;;  %v370_v58 = vld [vmem:[%s5906_s3 + $0x10] sm:$0xff] }
 0x1db   :  { %v374_v59 = vld [vmem:[%s5906_s3 + $0x30] sm:$0xff] }
 0x1e5   :  { %v4985_v60 = vpop.eup %4984 }
 0x1e6   :  { %v360_v61 = vmul.f32 0.5, %v4985_v60  ;;  %v371_v60 = vld [vmem:[%s5906_s3 + $0x18] sm:$0xff] }
 0x1e7   :  { %v4987_v62 = vpop.eup %4986 }
 0x1e8   :  { %v362_v2 = vadd.f32 0.5, %v360_v61  ;;  %v361_v3 = vmul.f32 0.5, %v4987_v62  ;;  %v375_v61 = vld [vmem:[%s5906_s3 + $0x38] sm:$0xff]  ;;  %v3954_v62 = vcombine.low %v378_v50, %v382_v51 }
 0x1e9   :  { %v3948_v7 = vcombine.low %v371_v60, %v375_v61 }
 0x1ea   :  { %v363_v4 = vadd.f32 0.5, %v361_v3  ;;  %v364_v5 = vmul.f32 %v362_v2, %v70_v0  ;;  %v3947_v0 = vcombine.high %v370_v58, %v374_v59  ;;  %v490_v2 = vld [vmem:[%s5906_s3 + $0x3d0] sm:$0xff] }
 0x1eb   :  { %v494_v3 = vld [vmem:[%s5906_s3 + $0x3f0] sm:$0xff] }
 0x1ec   :  { %v365_v6 = vmul.f32 %v363_v4, %v71_v1  ;;  %v5406_v12 = vpack.c.bf16 %v364_v5, %v364_v5  ;;  %v3949_v1 = vcombine.high %v371_v60, %v375_v61  ;;  %v491_v4 = vld [vmem:[%s5906_s3 + $0x3d8] sm:$0xff]  ;;  %v4067_v8 = vcombine.high %v490_v2, %v494_v3 }
 0x1ed   :  { %v495_v5 = vld [vmem:[%s5906_s3 + $0x3f8] sm:$0xff] }
 0x1ee   :  { %v367_v11 = vpack.c.bf16 %v365_v6, %v365_v6  ;;  %v3946_v6 = vcombine.low %v370_v58, %v374_v59  ;;  %v4069_v9 = vcombine.high %v491_v4, %v495_v5  ;;  %v4068_v16 = vcombine.low %v491_v4, %v495_v5 }
 0x1f0   :  { %1213 = vmatprep.mubr.bf16.mxu1 %v367_v11  ;;  %1254 = vmatprep.mubr.bf16.mxu0 %v367_v11 }
 0x1f1   :  { %1214 = vmatmul.mubr.bf16.vlgmr.msra.gmra.mxu1 %v5406_v12  ;;  %1255 = vmatmul.mubr.bf16.vlgmr.msra.gmra.mxu0 %v5406_v12 }
 0x1f2   :  { %1264 = vmatpush1.bf16.msra.mxu1 %v4002_v42  ;;  %1305 = vmatpush1.bf16.msra.mxu0 %v4004_v43  ;;  %v391_v42 = vld [vmem:[%s5906_s3 + $0xb8] sm:$0xff]  ;;  %v3970_v43 = vcombine.low %v394_v31, %v398_v32 }
 0x1f3   :  { %1295 = vmatprep.mubr.bf16.mxu1 %v367_v11  ;;  %1336 = vmatprep.mubr.bf16.mxu0 %v367_v11  ;;  %v3965_v48 = vcombine.high %v387_v41, %v391_v42  ;;  %v3964_v55 = vcombine.low %v387_v41, %v391_v42  ;;  %v486_v11 = vld [vmem:[%s5906_s3 + $0x3b0] sm:$0xff] }
 0x1f4   :  { %1265 = vmatprep.subr.bf16.mxu1 %v3995_v14  ;;  %1306 = vmatprep.subr.bf16.mxu0 %v3997_v15  ;;  %v487_v14 = vld [vmem:[%s5906_s3 + $0x3b8] sm:$0xff]  ;;  %v4066_v15 = vcombine.low %v490_v2, %v494_v3  ;;  %v4059_v17 = vcombine.high %v482_v10, %v486_v11  ;;  %v4058_v23 = vcombine.low %v482_v10, %v486_v11  ;;  %v4488_v10 = vld [vmem:[#allocation4 + $0xe0] ss:$16 sps:$4 sm:$0xff]  }
 0x1f5   :  { %v4061_v18 = vcombine.high %v483_v13, %v487_v14  ;;  %v4060_v24 = vcombine.low %v483_v13, %v487_v14  ;;  %v4491_v11 = vld [vmem:[#allocation4 + $0x2e0] ss:$16 sps:$4 sm:$0xff]   ;;  %v4496_v13 = vld [vmem:[#allocation4 + $0xc4] ss:$16 sps:$4 sm:$0xff]  }
 0x1f6   :  { %1266 = vmatpush1.bf16.msra.mxu1 %v3994_v19  ;;  %1307 = vmatpush1.bf16.msra.mxu0 %v3996_v20  ;;  %v474_v19 = vld [vmem:[%s5906_s3 + $0x350] sm:$0xff] }
 0x1f7   :  { %1267 = vmatprep.subr.bf16.mxu1 %v3987_v21  ;;  %1308 = vmatprep.subr.bf16.mxu0 %v3989_v22  ;;  %v478_v20 = vld [vmem:[%s5906_s3 + $0x370] sm:$0xff]  ;;  %v475_v21 = vld [vmem:[%s5906_s3 + $0x358] sm:$0xff] }
 0x1f8   :  { %v479_v22 = vld [vmem:[%s5906_s3 + $0x378] sm:$0xff]  ;;  %v4051_v25 = vcombine.high %v474_v19, %v478_v20  ;;  %v4050_v31 = vcombine.low %v474_v19, %v478_v20  ;;  %v4499_v14 = vld [vmem:[#allocation4 + $0x2c4] ss:$16 sps:$4 sm:$0xff]   ;;  %v4500_v19 = vld [vmem:[#allocation4 + $0xa0] ss:$16 sps:$4 sm:$0xff]  }
 0x1f9   :  { %v4053_v26 = vcombine.high %v475_v21, %v479_v22  ;;  %v4052_v32 = vcombine.low %v475_v21, %v479_v22  ;;  %v4503_v20 = vld [vmem:[#allocation4 + $0x2a0] ss:$16 sps:$4 sm:$0xff]   ;;  %v4508_v21 = vld [vmem:[#allocation4 + $0x84] ss:$16 sps:$4 sm:$0xff]  }
 0x1fa   :  { %1268 = vmatpush1.bf16.msra.mxu1 %v3986_v27  ;;  %1309 = vmatpush1.bf16.msra.mxu0 %v3988_v28  ;;  %v466_v27 = vld [vmem:[%s5906_s3 + $0x310] sm:$0xff] }
 0x1fb   :  { %1269 = vmatprep.subr.bf16.mxu1 %v3979_v29  ;;  %1310 = vmatprep.subr.bf16.mxu0 %v3981_v30  ;;  %v470_v28 = vld [vmem:[%s5906_s3 + $0x330] sm:$0xff]  ;;  %v467_v29 = vld [vmem:[%s5906_s3 + $0x318] sm:$0xff] }
 0x1fc   :  { %v471_v30 = vld [vmem:[%s5906_s3 + $0x338] sm:$0xff]  ;;  %v4043_v33 = vcombine.high %v466_v27, %v470_v28  ;;  %v4042_v39 = vcombine.low %v466_v27, %v470_v28  ;;  %v4511_v22 = vld [vmem:[#allocation4 + $0x284] ss:$16 sps:$4 sm:$0xff]   ;;  %v4515_v27 = vld [vmem:[#allocation4 + $0x260] ss:$16 sps:$4 sm:$0xff]  }
 0x1fd   :  { %v4045_v34 = vcombine.high %v467_v29, %v471_v30  ;;  %v4044_v40 = vcombine.low %v467_v29, %v471_v30  ;;  %v4520_v28 = vld [vmem:[#allocation4 + $0x44] ss:$16 sps:$4 sm:$0xff]   ;;  %v4518_v30 = vld [vmem:[#allocation4 + $0x40] ss:$16 sps:$4 sm:$0xff]  }
 0x1fe   :  { %1270 = vmatpush1.bf16.msra.mxu1 %v3978_v35  ;;  %1311 = vmatpush1.bf16.msra.mxu0 %v3980_v36  ;;  %v458_v35 = vld [vmem:[%s5906_s3 + $0x2d0] sm:$0xff] }
 0x1ff   :  { %1271 = vmatprep.subr.bf16.mxu1 %v3971_v37  ;;  %1312 = vmatprep.subr.bf16.mxu0 %v3973_v38  ;;  %v462_v36 = vld [vmem:[%s5906_s3 + $0x2f0] sm:$0xff]  ;;  %v459_v37 = vld [vmem:[%s5906_s3 + $0x2d8] sm:$0xff] }
 0x200   :  { %v463_v38 = vld [vmem:[%s5906_s3 + $0x2f8] sm:$0xff]  ;;  %v4035_v41 = vcombine.high %v458_v35, %v462_v36  ;;  %v4034_v50 = vcombine.low %v458_v35, %v462_v36  ;;  %v4523_v29 = vld [vmem:[#allocation4 + $0x244] ss:$16 sps:$4 sm:$0xff]   ;;  %v4527_v35 = vld [vmem:[#allocation4 + $0x220] ss:$16 sps:$4 sm:$0xff]  }
 0x201   :  { %v4037_v42 = vcombine.high %v459_v37, %v463_v38  ;;  %v4036_v51 = vcombine.low %v459_v37, %v463_v38  ;;  %v4532_v36 = vld [vmem:[#allocation4 + $0x4] ss:$16 sps:$4 sm:$0xff]   ;;  %v4530_v38 = vld [vmem:[#allocation4] ss:$16 sps:$4 sm:$0xff]  }
 0x202   :  { %1272 = vmatpush1.bf16.msra.mxu1 %v3970_v43  ;;  %1313 = vmatpush1.bf16.msra.mxu0 %v3972_v44  ;;  %v450_v43 = vld [vmem:[%s5906_s3 + $0x290] sm:$0xff] }
 0x203   :  { %1273 = vmatprep.subr.bf16.mxu1 %v3963_v45  ;;  %1314 = vmatprep.subr.bf16.mxu0 %v3965_v48  ;;  %v454_v44 = vld [vmem:[%s5906_s3 + $0x2b0] sm:$0xff]  ;;  %v451_v45 = vld [vmem:[%s5906_s3 + $0x298] sm:$0xff] }
 0x204   :  { %v455_v48 = vld [vmem:[%s5906_s3 + $0x2b8] sm:$0xff]  ;;  %v4027_v52 = vcombine.high %v450_v43, %v454_v44  ;;  %v4026_v58 = vcombine.low %v450_v43, %v454_v44  ;;  %v4535_v37 = vld [vmem:[#allocation4 + $0x204] ss:$16 sps:$4 sm:$0xff]   ;;  %v4539_v43 = vld [vmem:[#allocation4 + $0x3e0] ss:$16 sps:$4 sm:$0xff]  }
 0x205   :  { %v4029_v53 = vcombine.high %v451_v45, %v455_v48  ;;  %v4028_v59 = vcombine.low %v451_v45, %v455_v48  ;;  %v4544_v44 = vld [vmem:[#allocation4 + $0x1c4] ss:$16 sps:$4 sm:$0xff]   ;;  %v4542_v48 = vld [vmem:[#allocation4 + $0x1c0] ss:$16 sps:$4 sm:$0xff]  }
 0x206   :  { %1274 = vmatpush1.bf16.msra.mxu1 %v3962_v54  ;;  %1315 = vmatpush1.bf16.msra.mxu0 %v3964_v55  ;;  %v442_v54 = vld [vmem:[%s5906_s3 + $0x250] sm:$0xff] }
 0x207   :  { %1275 = vmatprep.subr.bf16.mxu1 %v3955_v56  ;;  %1316 = vmatprep.subr.bf16.mxu0 %v3957_v57  ;;  %v446_v55 = vld [vmem:[%s5906_s3 + $0x270] sm:$0xff]  ;;  %v443_v56 = vld [vmem:[%s5906_s3 + $0x258] sm:$0xff] }
 0x208   :  { %v447_v57 = vld [vmem:[%s5906_s3 + $0x278] sm:$0xff]  ;;  %v4019_v60 = vcombine.high %v442_v54, %v446_v55  ;;  %v4018_v2 = vcombine.low %v442_v54, %v446_v55  ;;  %v4547_v45 = vld [vmem:[#allocation4 + $0x3c4] ss:$16 sps:$4 sm:$0xff]   ;;  %v4551_v54 = vld [vmem:[#allocation4 + $0x3a0] ss:$16 sps:$4 sm:$0xff]  }
 0x209   :  { %v4021_v61 = vcombine.high %v443_v56, %v447_v57  ;;  %v4020_v3 = vcombine.low %v443_v56, %v447_v57  ;;  %v4556_v55 = vld [vmem:[#allocation4 + $0x184] ss:$16 sps:$4 sm:$0xff]   ;;  %v4554_v57 = vld [vmem:[#allocation4 + $0x180] ss:$16 sps:$4 sm:$0xff]  }
 0x20a   :  { %1276 = vmatpush1.bf16.msra.mxu1 %v3954_v62  ;;  %1317 = vmatpush1.bf16.msra.mxu0 %v3956_v63  ;;  %v434_v62 = vld [vmem:[%s5906_s3 + $0x210] sm:$0xff] }
 0x20b   :  { %1277 = vmatprep.subr.bf16.mxu1 %v3947_v0  ;;  %1318 = vmatprep.subr.bf16.mxu0 %v3949_v1  ;;  %v438_v63 = vld [vmem:[%s5906_s3 + $0x230] sm:$0xff]  ;;  %v435_v0 = vld [vmem:[%s5906_s3 + $0x218] sm:$0xff] }
 0x20c   :  { %v439_v1 = vld [vmem:[%s5906_s3 + $0x238] sm:$0xff]  ;;  %v4011_v4 = vcombine.high %v434_v62, %v438_v63  ;;  %v4559_v56 = vld [vmem:[#allocation4 + $0x384] ss:$16 sps:$4 sm:$0xff]  }
 0x20d   :  { %v4013_v5 = vcombine.high %v435_v0, %v439_v1 }
 0x20e   :  { %1278 = vmatpush1.bf16.msra.mxu1 %v3946_v6  ;;  %1319 = vmatpush1.bf16.msra.mxu0 %v3948_v7  ;;  %v4010_v6 = vcombine.low %v434_v62, %v438_v63  ;;  %v4012_v7 = vcombine.low %v435_v0, %v439_v1  ;;  %v4563_v62 = vld [vmem:[#allocation4 + $0x360] ss:$16 sps:$4 sm:$0xff]   ;;  %v4568_v63 = vld [vmem:[#allocation4 + $0x144] ss:$16 sps:$4 sm:$0xff]  }
 0x20f   :  { %1279 = vmatprep.subr.bf16.mxu1 %v4067_v8  ;;  %1320 = vmatprep.subr.bf16.mxu0 %v4069_v9  ;;  %v4490_v8 = vld [vmem:[#allocation4 + $0xe4] ss:$16 sps:$4 sm:$0xff]   ;;  %v4566_v1 = vld [vmem:[#allocation4 + $0x140] ss:$16 sps:$4 sm:$0xff]  }
 0x210   :  { %v4493_v9 = vld [vmem:[#allocation4 + $0x2e4] ss:$16 sps:$4 sm:$0xff]  }
 0x211   :  { %v4571_v0 = vld [vmem:[#allocation4 + $0x344] ss:$16 sps:$4 sm:$0xff]  }
 0x212   :  { %1280 = vmatpush2.bf16.msra.mxu1 %v4066_v15  ;;  %1321 = vmatpush2.bf16.msra.mxu0 %v4068_v16  ;;  %v4494_v15 = vld [vmem:[#allocation4 + $0xc0] ss:$16 sps:$4 sm:$0xff]  }
 0x213   :  { %1281 = vmatprep.subr.bf16.mxu1 %v4059_v17  ;;  %1322 = vmatprep.subr.bf16.mxu0 %v4061_v18  ;;  %v4497_v16 = vld [vmem:[#allocation4 + $0x2c0] ss:$16 sps:$4 sm:$0xff]   ;;  %v4502_v17 = vld [vmem:[#allocation4 + $0xa4] ss:$16 sps:$4 sm:$0xff]  }
 0x214   :  { %v4505_v18 = vld [vmem:[#allocation4 + $0x2a4] ss:$16 sps:$4 sm:$0xff]  }
 0x216   :  { %1282 = vmatpush2.bf16.msra.mxu1 %v4058_v23  ;;  %1323 = vmatpush2.bf16.msra.mxu0 %v4060_v24  ;;  %v4506_v23 = vld [vmem:[#allocation4 + $0x80] ss:$16 sps:$4 sm:$0xff]   ;;  %v4514_v24 = vld [vmem:[#allocation4 + $0x64] ss:$16 sps:$4 sm:$0xff]  }
 0x217   :  { %1283 = vmatprep.subr.bf16.mxu1 %v4051_v25  ;;  %1324 = vmatprep.subr.bf16.mxu0 %v4053_v26  ;;  %v4517_v25 = vld [vmem:[#allocation4 + $0x264] ss:$16 sps:$4 sm:$0xff]   ;;  %v4512_v26 = vld [vmem:[#allocation4 + $0x60] ss:$16 sps:$4 sm:$0xff]  }
 0x21a   :  { %1284 = vmatpush2.bf16.msra.mxu1 %v4050_v31  ;;  %1325 = vmatpush2.bf16.msra.mxu0 %v4052_v32  ;;  %v4521_v31 = vld [vmem:[#allocation4 + $0x240] ss:$16 sps:$4 sm:$0xff]   ;;  %v4526_v32 = vld [vmem:[#allocation4 + $0x24] ss:$16 sps:$4 sm:$0xff]  }
 0x21b   :  { %1285 = vmatprep.subr.bf16.mxu1 %v4043_v33  ;;  %1326 = vmatprep.subr.bf16.mxu0 %v4045_v34  ;;  %v4529_v33 = vld [vmem:[#allocation4 + $0x224] ss:$16 sps:$4 sm:$0xff]   ;;  %v4524_v34 = vld [vmem:[#allocation4 + $0x20] ss:$16 sps:$4 sm:$0xff]  }
 0x21e   :  { %1286 = vmatpush2.bf16.msra.mxu1 %v4042_v39  ;;  %1327 = vmatpush2.bf16.msra.mxu0 %v4044_v40  ;;  %v4533_v39 = vld [vmem:[#allocation4 + $0x200] ss:$16 sps:$4 sm:$0xff]   ;;  %v4538_v40 = vld [vmem:[#allocation4 + $0x1e4] ss:$16 sps:$4 sm:$0xff]  }
 0x21f   :  { %1287 = vmatprep.subr.bf16.mxu1 %v4035_v41  ;;  %1328 = vmatprep.subr.bf16.mxu0 %v4037_v42  ;;  %v4541_v41 = vld [vmem:[#allocation4 + $0x3e4] ss:$16 sps:$4 sm:$0xff]   ;;  %v4536_v42 = vld [vmem:[#allocation4 + $0x1e0] ss:$16 sps:$4 sm:$0xff]  }
 0x222   :  { %1288 = vmatpush2.bf16.msra.mxu1 %v4034_v50  ;;  %1329 = vmatpush2.bf16.msra.mxu0 %v4036_v51  ;;  %v4545_v50 = vld [vmem:[#allocation4 + $0x3c0] ss:$16 sps:$4 sm:$0xff]   ;;  %v4550_v51 = vld [vmem:[#allocation4 + $0x1a4] ss:$16 sps:$4 sm:$0xff]  }
 0x223   :  { %1289 = vmatprep.subr.bf16.mxu1 %v4027_v52  ;;  %1330 = vmatprep.subr.bf16.mxu0 %v4029_v53  ;;  %v4553_v52 = vld [vmem:[#allocation4 + $0x3a4] ss:$16 sps:$4 sm:$0xff]   ;;  %v4548_v53 = vld [vmem:[#allocation4 + $0x1a0] ss:$16 sps:$4 sm:$0xff]  }
 0x226   :  { %1290 = vmatpush2.bf16.msra.mxu1 %v4026_v58  ;;  %1331 = vmatpush2.bf16.msra.mxu0 %v4028_v59  ;;  %v4557_v58 = vld [vmem:[#allocation4 + $0x380] ss:$16 sps:$4 sm:$0xff]   ;;  %v4562_v59 = vld [vmem:[#allocation4 + $0x164] ss:$16 sps:$4 sm:$0xff]  }
 0x227   :  { %1291 = vmatprep.subr.bf16.mxu1 %v4019_v60  ;;  %1332 = vmatprep.subr.bf16.mxu0 %v4021_v61  ;;  %v4565_v60 = vld [vmem:[#allocation4 + $0x364] ss:$16 sps:$4 sm:$0xff]   ;;  %v4560_v61 = vld [vmem:[#allocation4 + $0x160] ss:$16 sps:$4 sm:$0xff]  }
 0x22a   :  { %1292 = vmatpush2.bf16.msra.mxu1 %v4018_v2  ;;  %1333 = vmatpush2.bf16.msra.mxu0 %v4020_v3  ;;  %v4569_v2 = vld [vmem:[#allocation4 + $0x340] ss:$16 sps:$4 sm:$0xff]   ;;  %v4574_v3 = vld [vmem:[#allocation4 + $0x124] ss:$16 sps:$4 sm:$0xff]  }
 0x22b   :  { %1293 = vmatprep.subr.bf16.mxu1 %v4011_v4  ;;  %1334 = vmatprep.subr.bf16.mxu0 %v4013_v5  ;;  %v4577_v4 = vld [vmem:[#allocation4 + $0x324] ss:$16 sps:$4 sm:$0xff]   ;;  %v4572_v5 = vld [vmem:[#allocation4 + $0x120] ss:$16 sps:$4 sm:$0xff]  }
 0x22e   :  { %1294 = vmatpush2.bf16.msra.mxu1 %v4010_v6  ;;  %1335 = vmatpush2.bf16.msra.mxu0 %v4012_v7  ;;  %v4575_v6 = vld [vmem:[#allocation4 + $0x320] ss:$16 sps:$4 sm:$0xff]   ;;  %v4580_v7 = vld [vmem:[#allocation4 + $0x104] ss:$16 sps:$4 sm:$0xff]  }
 0x22f   :  { %2920 = vmatprep.subr.bf16.mxu1 %v4490_v8  ;;  %2961 = vmatprep.subr.bf16.mxu0 %v4493_v9  ;;  %v4583_v8 = vld [vmem:[#allocation4 + $0x304] ss:$16 sps:$4 sm:$0xff]   ;;  %v4578_v9 = vld [vmem:[#allocation4 + $0x100] ss:$16 sps:$4 sm:$0xff]  }
 0x231   :  { %1296 = vmatmul.mubr.bf16.vlgmr.msra.gmra.mxu1 %v5406_v12  ;;  %1337 = vmatmul.mubr.bf16.vlgmr.msra.gmra.mxu0 %v5406_v12  ;;  %v4509_v12 = vld [vmem:[#allocation4 + $0x280] ss:$16 sps:$4 sm:$0xff]  }
 0x232   :  { %2921 = vmatpush1.bf16.msra.mxu1 %v4488_v10  ;;  %2962 = vmatpush1.bf16.msra.mxu0 %v4491_v11  ;;  %v4581_v10 = vld [vmem:[#allocation4 + $0x300] ss:$16 sps:$4 sm:$0xff]   ;;  %v4586_v11 = vld [vmem:[#allocation4 + $0x4e4] ss:$16 sps:$4 sm:$0xff]  }
 0x233   :  { %2922 = vmatprep.subr.bf16.mxu1 %v4496_v13  ;;  %2963 = vmatprep.subr.bf16.mxu0 %v4499_v14  ;;  %v4589_v13 = vld [vmem:[#allocation4 + $0x6e4] ss:$16 sps:$4 sm:$0xff]   ;;  %v497_v14 = vld [vmem:[#allocation6 + $0x2] ss:$8 sm:$0xf] }
 0x236   :  { %2923 = vmatpush1.bf16.msra.mxu1 %v4494_v15  ;;  %2964 = vmatpush1.bf16.msra.mxu0 %v4497_v16  ;;  %v498_v15 = vld [vmem:[#allocation6 + $0x2] ss:$8 sm:$0xf0] }
 0x237   :  { %2924 = vmatprep.subr.bf16.mxu1 %v4502_v17  ;;  %2965 = vmatprep.subr.bf16.mxu0 %v4505_v18  ;;  %v5580_v16 = vor.u32 %v498_v15, %v497_v14  ;;  %v511_v17 = vsub.s32 2, %v5381_v46  ;;  %v515_v18 = vsub.s32 3, %v5381_v46  ;;  %v4632_v14 = vld [vmem:[#allocation4 + $0x5e0] ss:$16 sps:$4 sm:$0xff]  }
 0x238   :  { %v4635_v15 = vld [vmem:[#allocation4 + $0x7e0] ss:$16 sps:$4 sm:$0xff]  }
 0x23a   :  { %2925 = vmatpush1.bf16.msra.mxu1 %v4500_v19  ;;  %2966 = vmatpush1.bf16.msra.mxu0 %v4503_v20  ;;  %v504_v19 = vrot.slane %v5580_v16, %v5384_v47  ;;  %v512_v20 = vrot.slane %v5580_v16, %v511_v17 }
 0x23b   :  { %2926 = vmatprep.subr.bf16.mxu1 %v4508_v21  ;;  %2967 = vmatprep.subr.bf16.mxu0 %v4511_v22  ;;  %v508_v21 = vrot.slane %v5580_v16, %v5387_v49  ;;  %v516_v22 = vrot.slane %v5580_v16, %v515_v18 }
 0x23e   :  { %2927 = vmatpush1.bf16.msra.mxu1 %v4506_v23  ;;  %2968 = vmatpush1.bf16.msra.mxu0 %v4509_v12 }
 0x23f   :  { %2928 = vmatprep.subr.bf16.mxu1 %v4514_v24  ;;  %2969 = vmatprep.subr.bf16.mxu0 %v4517_v25 }
 0x242   :  { %2929 = vmatpush1.bf16.msra.mxu1 %v4512_v26  ;;  %2970 = vmatpush1.bf16.msra.mxu0 %v4515_v27 }
 0x243   :  { %2930 = vmatprep.subr.bf16.mxu1 %v4520_v28  ;;  %2971 = vmatprep.subr.bf16.mxu0 %v4523_v29 }
 0x246   :  { %2931 = vmatpush1.bf16.msra.mxu1 %v4518_v30  ;;  %2972 = vmatpush1.bf16.msra.mxu0 %v4521_v31 }
 0x247   :  { %2932 = vmatprep.subr.bf16.mxu1 %v4526_v32  ;;  %2973 = vmatprep.subr.bf16.mxu0 %v4529_v33 }
 0x24a   :  { %2933 = vmatpush1.bf16.msra.mxu1 %v4524_v34  ;;  %2974 = vmatpush1.bf16.msra.mxu0 %v4527_v35 }
 0x24b   :  { %2934 = vmatprep.subr.bf16.mxu1 %v4532_v36  ;;  %2975 = vmatprep.subr.bf16.mxu0 %v4535_v37 }
 0x24e   :  { %2935 = vmatpush1.bf16.msra.mxu1 %v4530_v38  ;;  %2976 = vmatpush1.bf16.msra.mxu0 %v4533_v39 }
 0x24f   :  { %2936 = vmatprep.subr.bf16.mxu1 %v4538_v40  ;;  %2977 = vmatprep.subr.bf16.mxu0 %v4541_v41  ;;  %v4584_v40 = vld [vmem:[#allocation4 + $0x4e0] ss:$16 sps:$4 sm:$0xff]  }
 0x250   :  { %v4587_v41 = vld [vmem:[#allocation4 + $0x6e0] ss:$16 sps:$4 sm:$0xff]  }
 0x252   :  { %2937 = vmatpush2.bf16.msra.mxu1 %v4536_v42  ;;  %2978 = vmatpush2.bf16.msra.mxu0 %v4539_v43 }
 0x253   :  { %2938 = vmatprep.subr.bf16.mxu1 %v4544_v44  ;;  %2979 = vmatprep.subr.bf16.mxu0 %v4547_v45  ;;  %v4592_v44 = vld [vmem:[#allocation4 + $0x4c4] ss:$16 sps:$4 sm:$0xff]  }
 0x254   :  { %v4595_v45 = vld [vmem:[#allocation4 + $0x6c4] ss:$16 sps:$4 sm:$0xff]  }
 0x256   :  { %2939 = vmatpush2.bf16.msra.mxu1 %v4542_v48  ;;  %2980 = vmatpush2.bf16.msra.mxu0 %v4545_v50  ;;  %v4590_v48 = vld [vmem:[#allocation4 + $0x4c0] ss:$16 sps:$4 sm:$0xff]  }
 0x257   :  { %2940 = vmatprep.subr.bf16.mxu1 %v4550_v51  ;;  %2981 = vmatprep.subr.bf16.mxu0 %v4553_v52  ;;  %v4593_v50 = vld [vmem:[#allocation4 + $0x6c0] ss:$16 sps:$4 sm:$0xff]   ;;  %v4598_v51 = vld [vmem:[#allocation4 + $0x4a4] ss:$16 sps:$4 sm:$0xff]  }
 0x258   :  { %v4601_v52 = vld [vmem:[#allocation4 + $0x6a4] ss:$16 sps:$4 sm:$0xff]  }
 0x25a   :  { %2941 = vmatpush2.bf16.msra.mxu1 %v4548_v53  ;;  %2982 = vmatpush2.bf16.msra.mxu0 %v4551_v54  ;;  %v4596_v53 = vld [vmem:[#allocation4 + $0x4a0] ss:$16 sps:$4 sm:$0xff]  }
 0x25b   :  { %2942 = vmatprep.subr.bf16.mxu1 %v4556_v55  ;;  %2983 = vmatprep.subr.bf16.mxu0 %v4559_v56  ;;  %v4599_v54 = vld [vmem:[#allocation4 + $0x6a0] ss:$16 sps:$4 sm:$0xff]   ;;  %v4604_v55 = vld [vmem:[#allocation4 + $0x484] ss:$16 sps:$4 sm:$0xff]  }
 0x25c   :  { %v4607_v56 = vld [vmem:[#allocation4 + $0x684] ss:$16 sps:$4 sm:$0xff]  }
 0x25e   :  { %2943 = vmatpush2.bf16.msra.mxu1 %v4554_v57  ;;  %2984 = vmatpush2.bf16.msra.mxu0 %v4557_v58  ;;  %v4602_v57 = vld [vmem:[#allocation4 + $0x480] ss:$16 sps:$4 sm:$0xff]  }
 0x25f   :  { %2944 = vmatprep.subr.bf16.mxu1 %v4562_v59  ;;  %2985 = vmatprep.subr.bf16.mxu0 %v4565_v60  ;;  %v4605_v58 = vld [vmem:[#allocation4 + $0x680] ss:$16 sps:$4 sm:$0xff]   ;;  %v4610_v59 = vld [vmem:[#allocation4 + $0x464] ss:$16 sps:$4 sm:$0xff]  }
 0x260   :  { %v4613_v60 = vld [vmem:[#allocation4 + $0x664] ss:$16 sps:$4 sm:$0xff]  }
 0x262   :  { %2945 = vmatpush2.bf16.msra.mxu1 %v4560_v61  ;;  %2986 = vmatpush2.bf16.msra.mxu0 %v4563_v62  ;;  %v4608_v61 = vld [vmem:[#allocation4 + $0x460] ss:$16 sps:$4 sm:$0xff]  }
 0x263   :  { %2946 = vmatprep.subr.bf16.mxu1 %v4568_v63  ;;  %2987 = vmatprep.subr.bf16.mxu0 %v4571_v0  ;;  %v4611_v62 = vld [vmem:[#allocation4 + $0x660] ss:$16 sps:$4 sm:$0xff]   ;;  %v4616_v63 = vld [vmem:[#allocation4 + $0x444] ss:$16 sps:$4 sm:$0xff]  }
 0x264   :  { %v4619_v0 = vld [vmem:[#allocation4 + $0x644] ss:$16 sps:$4 sm:$0xff]  }
 0x266   :  { %2947 = vmatpush2.bf16.msra.mxu1 %v4566_v1  ;;  %2988 = vmatpush2.bf16.msra.mxu0 %v4569_v2  ;;  %v4614_v1 = vld [vmem:[#allocation4 + $0x440] ss:$16 sps:$4 sm:$0xff]  }
 0x267   :  { %2948 = vmatprep.subr.bf16.mxu1 %v4574_v3  ;;  %2989 = vmatprep.subr.bf16.mxu0 %v4577_v4  ;;  %v4617_v2 = vld [vmem:[#allocation4 + $0x640] ss:$16 sps:$4 sm:$0xff]   ;;  %v4622_v3 = vld [vmem:[#allocation4 + $0x424] ss:$16 sps:$4 sm:$0xff]  }
 0x268   :  { %v4625_v4 = vld [vmem:[#allocation4 + $0x624] ss:$16 sps:$4 sm:$0xff]  }
 0x26a   :  { %2949 = vmatpush2.bf16.msra.mxu1 %v4572_v5  ;;  %2990 = vmatpush2.bf16.msra.mxu0 %v4575_v6  ;;  %v4620_v5 = vld [vmem:[#allocation4 + $0x420] ss:$16 sps:$4 sm:$0xff]  }
 0x26b   :  { %2950 = vmatprep.subr.bf16.mxu1 %v4580_v7  ;;  %2991 = vmatprep.subr.bf16.mxu0 %v4583_v8  ;;  %v4623_v6 = vld [vmem:[#allocation4 + $0x620] ss:$16 sps:$4 sm:$0xff]   ;;  %v4628_v7 = vld [vmem:[#allocation4 + $0x404] ss:$16 sps:$4 sm:$0xff]  }
 0x26c   :  { %v4631_v8 = vld [vmem:[#allocation4 + $0x604] ss:$16 sps:$4 sm:$0xff]  }
 0x26e   :  { %2951 = vmatpush2.bf16.msra.mxu1 %v4578_v9  ;;  %2992 = vmatpush2.bf16.msra.mxu0 %v4581_v10  ;;  %v4626_v9 = vld [vmem:[#allocation4 + $0x400] ss:$16 sps:$4 sm:$0xff]  }
 0x26f   :  { %3002 = vmatprep.subr.bf16.mxu1 %v4586_v11  ;;  %3043 = vmatprep.subr.bf16.mxu0 %v4589_v13  ;;  %v4629_v10 = vld [vmem:[#allocation4 + $0x600] ss:$16 sps:$4 sm:$0xff]   ;;  %v4634_v11 = vld [vmem:[#allocation4 + $0x5e4] ss:$16 sps:$4 sm:$0xff]  }
 0x270   :  { %v4637_v13 = vld [vmem:[#allocation4 + $0x7e4] ss:$16 sps:$4 sm:$0xff]  }
 0x2b1   :  { %v1215_v23 = vpop.f32.mrf.mxu1  ;;  %v1256_v12 = vpop.f32.mrf.mxu0 }
 0x2b2   :  { %v1216_v24 = vadd.f32 %v1215_v23, %v504_v19  ;;  %v1257_v25 = vadd.f32 %v1256_v12, %v512_v20  ;;  %v4640_v19 = vld [vmem:[#allocation4 + $0x5c4] ss:$16 sps:$4 sm:$0xff]  }
 0x2b3   :  { %v1217_v26 = vpop.f32.mrf.mxu1  ;;  %v1258_v27 = vpop.f32.mrf.mxu0  ;;  %v4643_v20 = vld [vmem:[#allocation4 + $0x7c4] ss:$16 sps:$4 sm:$0xff]  }
 0x2b4   :  { %v1218_v28 = vadd.f32 %v1217_v26, %v508_v21  ;;  %v1259_v29 = vadd.f32 %v1258_v27, %v516_v22  ;;  %v1345_v30 = vmax.f32 %v1216_v24, 0.0  ;;  %v1347_v31 = vmax.f32 %v1257_v25, 0.0  ;;  %v4638_v21 = vld [vmem:[#allocation4 + $0x5c0] ss:$16 sps:$4 sm:$0xff]   ;;  %v4646_v23 = vld [vmem:[#allocation4 + $0x5a4] ss:$16 sps:$4 sm:$0xff]  }
 0x2b5   :  { %v1219_v32 = vpop.f32.mrf.mxu1  ;;  %v1260_v33 = vpop.f32.mrf.mxu0  ;;  %v4641_v22 = vld [vmem:[#allocation4 + $0x7c0] ss:$16 sps:$4 sm:$0xff]   ;;  %v4649_v12 = vld [vmem:[#allocation4 + $0x7a4] ss:$16 sps:$4 sm:$0xff]  }
 0x2b6   :  { %v1346_v34 = vmax.f32 %v1218_v28, 0.0  ;;  %v1348_v35 = vmax.f32 %v1259_v29, 0.0  ;;  %v5598_v42 = vpack.c.bf16 %v1345_v30, %v1345_v30  ;;  %v5600_v43 = vpack.c.bf16 %v1347_v31, %v1347_v31  ;;  %v4644_v24 = vld [vmem:[#allocation4 + $0x5a0] ss:$16 sps:$4 sm:$0xff]   ;;  %v4652_v26 = vld [vmem:[#allocation4 + $0x584] ss:$16 sps:$4 sm:$0xff]  }
 0x2b7   :  { %v1220_v36 = vpop.f32.mrf.mxu1  ;;  %v1261_v37 = vpop.f32.mrf.mxu0  ;;  %v4647_v25 = vld [vmem:[#allocation4 + $0x7a0] ss:$16 sps:$4 sm:$0xff]   ;;  %v4655_v27 = vld [vmem:[#allocation4 + $0x784] ss:$16 sps:$4 sm:$0xff]  }
 0x2b8   :  { %v5594_v38 = vpack.c.bf16 %v1346_v34, %v1346_v34  ;;  %v5596_v39 = vpack.c.bf16 %v1348_v35, %v1348_v35  ;;  %v4650_v28 = vld [vmem:[#allocation4 + $0x580] ss:$16 sps:$4 sm:$0xff]   ;;  %v4658_v30 = vld [vmem:[#allocation4 + $0x564] ss:$16 sps:$4 sm:$0xff]   ;;  %v519_v36 = vsub.s32 4, %v5381_v46  ;;  %v527_v37 = vsub.s32 6, %v5381_v46 }
 0x2b9   :  { %v4653_v29 = vld [vmem:[#allocation4 + $0x780] ss:$16 sps:$4 sm:$0xff]   ;;  %v4661_v31 = vld [vmem:[#allocation4 + $0x764] ss:$16 sps:$4 sm:$0xff]  }
 0x2ba   :  { %2952 = vmatprep.mubr.bf16.mxu1 %v5594_v38  ;;  %2993 = vmatprep.mubr.bf16.mxu0 %v5596_v39  ;;  %v4656_v32 = vld [vmem:[#allocation4 + $0x560] ss:$16 sps:$4 sm:$0xff]   ;;  %v4664_v34 = vld [vmem:[#allocation4 + $0x544] ss:$16 sps:$4 sm:$0xff]  }
 0x2bb   :  { %2953 = vmatmul.mubr.bf16.vlgmr.msra.gmra.mxu1 %v5598_v42  ;;  %2994 = vmatmul.mubr.bf16.vlgmr.msra.gmra.mxu0 %v5600_v43  ;;  %v4659_v33 = vld [vmem:[#allocation4 + $0x760] ss:$16 sps:$4 sm:$0xff]   ;;  %v4667_v35 = vld [vmem:[#allocation4 + $0x744] ss:$16 sps:$4 sm:$0xff]  }
 0x2bc   :  { %3003 = vmatpush1.bf16.msra.mxu1 %v4584_v40  ;;  %3044 = vmatpush1.bf16.msra.mxu0 %v4587_v41  ;;  %v4662_v40 = vld [vmem:[#allocation4 + $0x540] ss:$16 sps:$4 sm:$0xff]  }
 0x2bd   :  { %3004 = vmatprep.subr.bf16.mxu1 %v4592_v44  ;;  %3045 = vmatprep.subr.bf16.mxu0 %v4595_v45  ;;  %v4665_v41 = vld [vmem:[#allocation4 + $0x740] ss:$16 sps:$4 sm:$0xff]   ;;  %v523_v44 = vsub.s32 5, %v5381_v46  ;;  %v531_v45 = vsub.s32 7, %v5381_v46 }
 0x2c0   :  { %3005 = vmatpush1.bf16.msra.mxu1 %v4590_v48  ;;  %3046 = vmatpush1.bf16.msra.mxu0 %v4593_v50  ;;  %v4670_v48 = vld [vmem:[#allocation4 + $0x524] ss:$16 sps:$4 sm:$0xff]  }
 0x2c1   :  { %3006 = vmatprep.subr.bf16.mxu1 %v4598_v51  ;;  %3047 = vmatprep.subr.bf16.mxu0 %v4601_v52  ;;  %v4673_v50 = vld [vmem:[#allocation4 + $0x724] ss:$16 sps:$4 sm:$0xff]   ;;  %v520_v51 = vrot.slane %v5580_v16, %v519_v36  ;;  %v528_v52 = vrot.slane %v5580_v16, %v527_v37  ;;  %v4707_v36 = vld [vmem:[#allocation4 + $0x268] ss:$16 sps:$4 sm:$0xff]   ;;  %v4712_v37 = vld [vmem:[#allocation4 + $0x4c] ss:$16 sps:$4 sm:$0xff]  }
 0x2c4   :  { %3007 = vmatpush1.bf16.msra.mxu1 %v4596_v53  ;;  %3048 = vmatpush1.bf16.msra.mxu0 %v4599_v54  ;;  %v524_v53 = vrot.slane %v5580_v16, %v523_v44  ;;  %v532_v54 = vrot.slane %v5580_v16, %v531_v45  ;;  %v4713_v44 = vld [vmem:[#allocation4 + $0x248] ss:$16 sps:$4 sm:$0xff]   ;;  %v4718_v45 = vld [vmem:[#allocation4 + $0x2c] ss:$16 sps:$4 sm:$0xff]  }
 0x2c5   :  { %3008 = vmatprep.subr.bf16.mxu1 %v4604_v55  ;;  %3049 = vmatprep.subr.bf16.mxu0 %v4607_v56  ;;  %v4668_v55 = vld [vmem:[#allocation4 + $0x520] ss:$16 sps:$4 sm:$0xff]  }
 0x2c6   :  { %v4671_v56 = vld [vmem:[#allocation4 + $0x720] ss:$16 sps:$4 sm:$0xff]  }
 0x2c8   :  { %3009 = vmatpush1.bf16.msra.mxu1 %v4602_v57  ;;  %3050 = vmatpush1.bf16.msra.mxu0 %v4605_v58 }
 0x2c9   :  { %3010 = vmatprep.subr.bf16.mxu1 %v4610_v59  ;;  %3051 = vmatprep.subr.bf16.mxu0 %v4613_v60  ;;  %v4676_v59 = vld [vmem:[#allocation4 + $0x504] ss:$16 sps:$4 sm:$0xff]  }
 0x2ca   :  { %v4679_v60 = vld [vmem:[#allocation4 + $0x704] ss:$16 sps:$4 sm:$0xff]  }
 0x2cc   :  { %3011 = vmatpush1.bf16.msra.mxu1 %v4608_v61  ;;  %3052 = vmatpush1.bf16.msra.mxu0 %v4611_v62 }
 0x2cd   :  { %3012 = vmatprep.subr.bf16.mxu1 %v4616_v63  ;;  %3053 = vmatprep.subr.bf16.mxu0 %v4619_v0 }
 0x2d0   :  { %3013 = vmatpush1.bf16.msra.mxu1 %v4614_v1  ;;  %3054 = vmatpush1.bf16.msra.mxu0 %v4617_v2 }
 0x2d1   :  { %3014 = vmatprep.subr.bf16.mxu1 %v4622_v3  ;;  %3055 = vmatprep.subr.bf16.mxu0 %v4625_v4  ;;  %v4674_v3 = vld [vmem:[#allocation4 + $0x500] ss:$16 sps:$4 sm:$0xff]  }
 0x2d2   :  { %v4677_v4 = vld [vmem:[#allocation4 + $0x700] ss:$16 sps:$4 sm:$0xff]  }
 0x2d4   :  { %3015 = vmatpush1.bf16.msra.mxu1 %v4620_v5  ;;  %3056 = vmatpush1.bf16.msra.mxu0 %v4623_v6 }
 0x2d5   :  { %3016 = vmatprep.subr.bf16.mxu1 %v4628_v7  ;;  %3057 = vmatprep.subr.bf16.mxu0 %v4631_v8  ;;  %v4682_v8 = vld [vmem:[#allocation4 + $0xec] ss:$16 sps:$4 sm:$0xff]  }
 0x2d8   :  { %3017 = vmatpush1.bf16.msra.mxu1 %v4626_v9  ;;  %3058 = vmatpush1.bf16.msra.mxu0 %v4629_v10  ;;  %v4685_v9 = vld [vmem:[#allocation4 + $0x2ec] ss:$16 sps:$4 sm:$0xff]  }
 0x2d9   :  { %3018 = vmatprep.subr.bf16.mxu1 %v4634_v11  ;;  %3059 = vmatprep.subr.bf16.mxu0 %v4637_v13 }
 0x2dc   :  { %3019 = vmatpush2.bf16.msra.mxu1 %v4632_v14  ;;  %3060 = vmatpush2.bf16.msra.mxu0 %v4635_v15 }
 0x2dd   :  { %3020 = vmatprep.subr.bf16.mxu1 %v4640_v19  ;;  %3061 = vmatprep.subr.bf16.mxu0 %v4643_v20  ;;  %v4680_v20 = vld [vmem:[#allocation4 + $0xe8] ss:$16 sps:$4 sm:$0xff]  }
 0x2e0   :  { %3021 = vmatpush2.bf16.msra.mxu1 %v4638_v21  ;;  %3062 = vmatpush2.bf16.msra.mxu0 %v4641_v22 }
 0x2e1   :  { %3022 = vmatprep.subr.bf16.mxu1 %v4646_v23  ;;  %3063 = vmatprep.subr.bf16.mxu0 %v4649_v12  ;;  %v4683_v23 = vld [vmem:[#allocation4 + $0x2e8] ss:$16 sps:$4 sm:$0xff]   ;;  %v4688_v12 = vld [vmem:[#allocation4 + $0xcc] ss:$16 sps:$4 sm:$0xff]  }
 0x2e4   :  { %3023 = vmatpush2.bf16.msra.mxu1 %v4644_v24  ;;  %3064 = vmatpush2.bf16.msra.mxu0 %v4647_v25  ;;  %v4691_v24 = vld [vmem:[#allocation4 + $0x2cc] ss:$16 sps:$4 sm:$0xff]   ;;  %v4686_v25 = vld [vmem:[#allocation4 + $0xc8] ss:$16 sps:$4 sm:$0xff]  }
 0x2e5   :  { %3024 = vmatprep.subr.bf16.mxu1 %v4652_v26  ;;  %3065 = vmatprep.subr.bf16.mxu0 %v4655_v27  ;;  %v4689_v26 = vld [vmem:[#allocation4 + $0x2c8] ss:$16 sps:$4 sm:$0xff]   ;;  %v4694_v27 = vld [vmem:[#allocation4 + $0xac] ss:$16 sps:$4 sm:$0xff]  }
 0x2e8   :  { %3025 = vmatpush2.bf16.msra.mxu1 %v4650_v28  ;;  %3066 = vmatpush2.bf16.msra.mxu0 %v4653_v29  ;;  %v4697_v28 = vld [vmem:[#allocation4 + $0x2ac] ss:$16 sps:$4 sm:$0xff]   ;;  %v4692_v29 = vld [vmem:[#allocation4 + $0xa8] ss:$16 sps:$4 sm:$0xff]  }
 0x2e9   :  { %3026 = vmatprep.subr.bf16.mxu1 %v4658_v30  ;;  %3067 = vmatprep.subr.bf16.mxu0 %v4661_v31  ;;  %v4695_v30 = vld [vmem:[#allocation4 + $0x2a8] ss:$16 sps:$4 sm:$0xff]   ;;  %v4700_v31 = vld [vmem:[#allocation4 + $0x8c] ss:$16 sps:$4 sm:$0xff]  }
 0x2ec   :  { %3027 = vmatpush2.bf16.msra.mxu1 %v4656_v32  ;;  %3068 = vmatpush2.bf16.msra.mxu0 %v4659_v33  ;;  %v4703_v32 = vld [vmem:[#allocation4 + $0x28c] ss:$16 sps:$4 sm:$0xff]   ;;  %v4698_v33 = vld [vmem:[#allocation4 + $0x88] ss:$16 sps:$4 sm:$0xff]  }
 0x2ed   :  { %3028 = vmatprep.subr.bf16.mxu1 %v4664_v34  ;;  %3069 = vmatprep.subr.bf16.mxu0 %v4667_v35  ;;  %v4706_v34 = vld [vmem:[#allocation4 + $0x6c] ss:$16 sps:$4 sm:$0xff]   ;;  %v4704_v35 = vld [vmem:[#allocation4 + $0x68] ss:$16 sps:$4 sm:$0xff]  }
 0x2f0   :  { %3029 = vmatpush2.bf16.msra.mxu1 %v4662_v40  ;;  %3070 = vmatpush2.bf16.msra.mxu0 %v4665_v41  ;;  %v4715_v40 = vld [vmem:[#allocation4 + $0x24c] ss:$16 sps:$4 sm:$0xff]   ;;  %v4710_v41 = vld [vmem:[#allocation4 + $0x48] ss:$16 sps:$4 sm:$0xff]  }
 0x2f1   :  { %v1297_v57 = vpop.f32.mrf.mxu1  ;;  %v1338_v58 = vpop.f32.mrf.mxu0  ;;  %3030 = vmatprep.subr.bf16.mxu1 %v4670_v48  ;;  %3071 = vmatprep.subr.bf16.mxu0 %v4673_v50  ;;  %v4721_v48 = vld [vmem:[#allocation4 + $0x22c] ss:$16 sps:$4 sm:$0xff]   ;;  %v4716_v50 = vld [vmem:[#allocation4 + $0x28] ss:$16 sps:$4 sm:$0xff]  }
 0x2f2   :  { %v1298_v61 = vadd.f32 %v1297_v57, %v520_v51  ;;  %v1339_v62 = vadd.f32 %v1338_v58, %v528_v52  ;;  %v4719_v51 = vld [vmem:[#allocation4 + $0x228] ss:$16 sps:$4 sm:$0xff]   ;;  %v4724_v52 = vld [vmem:[#allocation4 + $0xc] ss:$16 sps:$4 sm:$0xff]  }
 0x2f3   :  { %v1299_v63 = vpop.f32.mrf.mxu1  ;;  %v1340_v0 = vpop.f32.mrf.mxu0  ;;  %v4733_v57 = vld [vmem:[#allocation4 + $0x3ec] ss:$16 sps:$4 sm:$0xff]   ;;  %v4728_v58 = vld [vmem:[#allocation4 + $0x1e8] ss:$16 sps:$4 sm:$0xff]  }
 0x2f4   :  { %v1300_v1 = vadd.f32 %v1299_v63, %v524_v53  ;;  %v1341_v2 = vadd.f32 %v1340_v0, %v532_v54  ;;  %3031 = vmatpush2.bf16.msra.mxu1 %v4668_v55  ;;  %3072 = vmatpush2.bf16.msra.mxu0 %v4671_v56  ;;  %v1349_v5 = vmax.f32 %v1298_v61, 0.0  ;;  %v1351_v16 = vmax.f32 %v1339_v62, 0.0  ;;  %v4727_v53 = vld [vmem:[#allocation4 + $0x20c] ss:$16 sps:$4 sm:$0xff]   ;;  %v4722_v54 = vld [vmem:[#allocation4 + $0x8] ss:$16 sps:$4 sm:$0xff]  }
 0x2f5   :  { %v1301_v6 = vpop.f32.mrf.mxu1  ;;  %v1342_v7 = vpop.f32.mrf.mxu0  ;;  %3032 = vmatprep.subr.bf16.mxu1 %v4676_v59  ;;  %3073 = vmatprep.subr.bf16.mxu0 %v4679_v60  ;;  %v4725_v55 = vld [vmem:[#allocation4 + $0x208] ss:$16 sps:$4 sm:$0xff]   ;;  %v4730_v56 = vld [vmem:[#allocation4 + $0x1ec] ss:$16 sps:$4 sm:$0xff]  }
 0x2f6   :  { %v1350_v10 = vmax.f32 %v1300_v1, 0.0  ;;  %v1352_v11 = vmax.f32 %v1341_v2, 0.0  ;;  %v5618_v21 = vpack.c.bf16 %v1349_v5, %v1349_v5  ;;  %v5620_v22 = vpack.c.bf16 %v1351_v16, %v1351_v16  ;;  %v4731_v59 = vld [vmem:[#allocation4 + $0x3e8] ss:$16 sps:$4 sm:$0xff]   ;;  %v4736_v60 = vld [vmem:[#allocation4 + $0x1cc] ss:$16 sps:$4 sm:$0xff]  }
 0x2f7   :  { %v1302_v13 = vpop.f32.mrf.mxu1  ;;  %v1343_v14 = vpop.f32.mrf.mxu0  ;;  %v4739_v61 = vld [vmem:[#allocation4 + $0x3cc] ss:$16 sps:$4 sm:$0xff]   ;;  %v4734_v62 = vld [vmem:[#allocation4 + $0x1c8] ss:$16 sps:$4 sm:$0xff]  }
 0x2f8   :  { %v5614_v15 = vpack.c.bf16 %v1350_v10, %v1350_v10  ;;  %v5616_v19 = vpack.c.bf16 %v1352_v11, %v1352_v11  ;;  %3033 = vmatpush2.bf16.msra.mxu1 %v4674_v3  ;;  %3074 = vmatpush2.bf16.msra.mxu0 %v4677_v4  ;;  %v4737_v63 = vld [vmem:[#allocation4 + $0x3c8] ss:$16 sps:$4 sm:$0xff]   ;;  %v4742_v0 = vld [vmem:[#allocation4 + $0x1ac] ss:$16 sps:$4 sm:$0xff]  }
 0x2f9   :  { %3084 = vmatprep.subr.bf16.mxu1 %v4682_v8  ;;  %3125 = vmatprep.subr.bf16.mxu0 %v4685_v9  ;;  %v4745_v1 = vld [vmem:[#allocation4 + $0x3ac] ss:$16 sps:$4 sm:$0xff]   ;;  %v4740_v2 = vld [vmem:[#allocation4 + $0x1a8] ss:$16 sps:$4 sm:$0xff]  }
 0x2fa   :  { %3034 = vmatprep.mubr.bf16.mxu1 %v5614_v15  ;;  %3075 = vmatprep.mubr.bf16.mxu0 %v5616_v19  ;;  %v4743_v3 = vld [vmem:[#allocation4 + $0x3a8] ss:$16 sps:$4 sm:$0xff]   ;;  %v4748_v4 = vld [vmem:[#allocation4 + $0x18c] ss:$16 sps:$4 sm:$0xff]  }
 0x2fb   :  { %3035 = vmatmul.mubr.bf16.vlgmr.msra.gmra.mxu1 %v5618_v21  ;;  %3076 = vmatmul.mubr.bf16.vlgmr.msra.gmra.mxu0 %v5620_v22  ;;  %v4751_v5 = vld [vmem:[#allocation4 + $0x38c] ss:$16 sps:$4 sm:$0xff]   ;;  %v4746_v16 = vld [vmem:[#allocation4 + $0x188] ss:$16 sps:$4 sm:$0xff]  }
 0x2fc   :  { %3085 = vmatpush1.bf16.msra.mxu1 %v4680_v20  ;;  %3116 = vmatprep.mubr.bf16.mxu1 %v5594_v38  ;;  %v4701_v38 = vld [vmem:[#allocation4 + $0x288] ss:$16 sps:$4 sm:$0xff]   ;;  %v4754_v7 = vld [vmem:[#allocation4 + $0x16c] ss:$16 sps:$4 sm:$0xff]  }
 0x2fd   :  { %3126 = vmatpush1.bf16.msra.mxu0 %v4683_v23  ;;  %3157 = vmatprep.mubr.bf16.mxu0 %v5596_v39  ;;  %v4709_v39 = vld [vmem:[#allocation4 + $0x26c] ss:$16 sps:$4 sm:$0xff]   ;;  %v4749_v6 = vld [vmem:[#allocation4 + $0x388] ss:$16 sps:$4 sm:$0xff]  }
 0x2fe   :  { %3086 = vmatprep.subr.bf16.mxu1 %v4688_v12  ;;  %3127 = vmatprep.subr.bf16.mxu0 %v4691_v24  ;;  %v4757_v8 = vld [vmem:[#allocation4 + $0x36c] ss:$16 sps:$4 sm:$0xff]   ;;  %v4752_v9 = vld [vmem:[#allocation4 + $0x168] ss:$16 sps:$4 sm:$0xff]  }
 0x2ff   :  { %v4755_v10 = vld [vmem:[#allocation4 + $0x368] ss:$16 sps:$4 sm:$0xff]   ;;  %v4760_v11 = vld [vmem:[#allocation4 + $0x14c] ss:$16 sps:$4 sm:$0xff]  }
 0x300   :  { %3087 = vmatpush1.bf16.msra.mxu1 %v4686_v25  ;;  %v4763_v13 = vld [vmem:[#allocation4 + $0x34c] ss:$16 sps:$4 sm:$0xff]   ;;  %v4758_v14 = vld [vmem:[#allocation4 + $0x148] ss:$16 sps:$4 sm:$0xff]  }
 0x301   :  { %3128 = vmatpush1.bf16.msra.mxu0 %v4689_v26  ;;  %3088 = vmatprep.subr.bf16.mxu1 %v4694_v27  ;;  %v4761_v20 = vld [vmem:[#allocation4 + $0x348] ss:$16 sps:$4 sm:$0xff]   ;;  %v4766_v23 = vld [vmem:[#allocation4 + $0x12c] ss:$16 sps:$4 sm:$0xff]  }
 0x302   :  { %3129 = vmatprep.subr.bf16.mxu0 %v4697_v28  ;;  %v4769_v12 = vld [vmem:[#allocation4 + $0x32c] ss:$16 sps:$4 sm:$0xff]   ;;  %v4764_v24 = vld [vmem:[#allocation4 + $0x128] ss:$16 sps:$4 sm:$0xff]  }
 0x303   :  { %v4767_v25 = vld [vmem:[#allocation4 + $0x328] ss:$16 sps:$4 sm:$0xff]   ;;  %v4772_v26 = vld [vmem:[#allocation4 + $0x10c] ss:$16 sps:$4 sm:$0xff]  }
 0x304   :  { %3089 = vmatpush1.bf16.msra.mxu1 %v4692_v29  ;;  %v4775_v27 = vld [vmem:[#allocation4 + $0x30c] ss:$16 sps:$4 sm:$0xff]   ;;  %v4770_v28 = vld [vmem:[#allocation4 + $0x108] ss:$16 sps:$4 sm:$0xff]  }
 0x305   :  { %3130 = vmatpush1.bf16.msra.mxu0 %v4695_v30  ;;  %3090 = vmatprep.subr.bf16.mxu1 %v4700_v31  ;;  %v4773_v29 = vld [vmem:[#allocation4 + $0x308] ss:$16 sps:$4 sm:$0xff]   ;;  %v4778_v30 = vld [vmem:[#allocation4 + $0x4ec] ss:$16 sps:$4 sm:$0xff]  }
 0x306   :  { %3131 = vmatprep.subr.bf16.mxu0 %v4703_v32  ;;  %v4781_v31 = vld [vmem:[#allocation4 + $0x6ec] ss:$16 sps:$4 sm:$0xff]   ;;  %v4776_v32 = vld [vmem:[#allocation4 + $0x4e8] ss:$16 sps:$4 sm:$0xff]  }
 0x308   :  { %3091 = vmatpush1.bf16.msra.mxu1 %v4698_v33  ;;  %v4779_v33 = vld [vmem:[#allocation4 + $0x6e8] ss:$16 sps:$4 sm:$0xff]  }
 0x309   :  { %3132 = vmatpush1.bf16.msra.mxu0 %v4701_v38  ;;  %3092 = vmatprep.subr.bf16.mxu1 %v4706_v34  ;;  %v4784_v38 = vld [vmem:[#allocation4 + $0x4cc] ss:$16 sps:$4 sm:$0xff]  }
 0x30a   :  { %3133 = vmatprep.subr.bf16.mxu0 %v4709_v39  ;;  %v4787_v34 = vld [vmem:[#allocation4 + $0x6cc] ss:$16 sps:$4 sm:$0xff]   ;;  %v4782_v39 = vld [vmem:[#allocation4 + $0x4c8] ss:$16 sps:$4 sm:$0xff]  }
 0x30c   :  { %3093 = vmatpush1.bf16.msra.mxu1 %v4704_v35  ;;  %v4785_v35 = vld [vmem:[#allocation4 + $0x6c8] ss:$16 sps:$4 sm:$0xff]  }
 0x30d   :  { %3134 = vmatpush1.bf16.msra.mxu0 %v4707_v36  ;;  %3094 = vmatprep.subr.bf16.mxu1 %v4712_v37  ;;  %v4790_v36 = vld [vmem:[#allocation4 + $0x4ac] ss:$16 sps:$4 sm:$0xff]  }
 0x30e   :  { %3135 = vmatprep.subr.bf16.mxu0 %v4715_v40  ;;  %v4793_v37 = vld [vmem:[#allocation4 + $0x6ac] ss:$16 sps:$4 sm:$0xff]   ;;  %v4788_v40 = vld [vmem:[#allocation4 + $0x4a8] ss:$16 sps:$4 sm:$0xff]  }
 0x310   :  { %3095 = vmatpush1.bf16.msra.mxu1 %v4710_v41  ;;  %v4796_v41 = vld [vmem:[#allocation4 + $0x48c] ss:$16 sps:$4 sm:$0xff]  }
 0x311   :  { %3136 = vmatpush1.bf16.msra.mxu0 %v4713_v44  ;;  %3096 = vmatprep.subr.bf16.mxu1 %v4718_v45  ;;  %v4794_v44 = vld [vmem:[#allocation4 + $0x488] ss:$16 sps:$4 sm:$0xff]   ;;  %v4802_v45 = vld [vmem:[#allocation4 + $0x46c] ss:$16 sps:$4 sm:$0xff]  }
 0x312   :  { %3137 = vmatprep.subr.bf16.mxu0 %v4721_v48  ;;  %v4805_v48 = vld [vmem:[#allocation4 + $0x66c] ss:$16 sps:$4 sm:$0xff]  }
 0x314   :  { %3097 = vmatpush1.bf16.msra.mxu1 %v4716_v50  ;;  %v4803_v50 = vld [vmem:[#allocation4 + $0x668] ss:$16 sps:$4 sm:$0xff]  }
 0x315   :  { %3138 = vmatpush1.bf16.msra.mxu0 %v4719_v51  ;;  %3098 = vmatprep.subr.bf16.mxu1 %v4724_v52  ;;  %v4808_v51 = vld [vmem:[#allocation4 + $0x44c] ss:$16 sps:$4 sm:$0xff]  }
 0x316   :  { %3139 = vmatprep.subr.bf16.mxu0 %v4727_v53  ;;  %v4811_v52 = vld [vmem:[#allocation4 + $0x64c] ss:$16 sps:$4 sm:$0xff]   ;;  %v4806_v53 = vld [vmem:[#allocation4 + $0x448] ss:$16 sps:$4 sm:$0xff]  }
 0x318   :  { %3099 = vmatpush1.bf16.msra.mxu1 %v4722_v54  ;;  %v4809_v54 = vld [vmem:[#allocation4 + $0x648] ss:$16 sps:$4 sm:$0xff]  }
 0x319   :  { %3140 = vmatpush1.bf16.msra.mxu0 %v4725_v55  ;;  %3100 = vmatprep.subr.bf16.mxu1 %v4730_v56  ;;  %v4814_v55 = vld [vmem:[#allocation4 + $0x42c] ss:$16 sps:$4 sm:$0xff]  }
 0x31a   :  { %3141 = vmatprep.subr.bf16.mxu0 %v4733_v57  ;;  %v4817_v56 = vld [vmem:[#allocation4 + $0x62c] ss:$16 sps:$4 sm:$0xff]   ;;  %v4812_v57 = vld [vmem:[#allocation4 + $0x428] ss:$16 sps:$4 sm:$0xff]  }
 0x31c   :  { %3101 = vmatpush2.bf16.msra.mxu1 %v4728_v58  ;;  %v4815_v58 = vld [vmem:[#allocation4 + $0x628] ss:$16 sps:$4 sm:$0xff]  }
 0x31d   :  { %3142 = vmatpush2.bf16.msra.mxu0 %v4731_v59  ;;  %3102 = vmatprep.subr.bf16.mxu1 %v4736_v60  ;;  %v4820_v59 = vld [vmem:[#allocation4 + $0x40c] ss:$16 sps:$4 sm:$0xff]  }
 0x31e   :  { %3143 = vmatprep.subr.bf16.mxu0 %v4739_v61  ;;  %v4823_v60 = vld [vmem:[#allocation4 + $0x60c] ss:$16 sps:$4 sm:$0xff]   ;;  %v4818_v61 = vld [vmem:[#allocation4 + $0x408] ss:$16 sps:$4 sm:$0xff]  }
 0x320   :  { %3103 = vmatpush2.bf16.msra.mxu1 %v4734_v62  ;;  %v4821_v62 = vld [vmem:[#allocation4 + $0x608] ss:$16 sps:$4 sm:$0xff]  }
 0x321   :  { %3144 = vmatpush2.bf16.msra.mxu0 %v4737_v63  ;;  %3104 = vmatprep.subr.bf16.mxu1 %v4742_v0  ;;  %v4826_v63 = vld [vmem:[#allocation4 + $0x5ec] ss:$16 sps:$4 sm:$0xff]  }
 0x322   :  { %3145 = vmatprep.subr.bf16.mxu0 %v4745_v1  ;;  %v4829_v0 = vld [vmem:[#allocation4 + $0x7ec] ss:$16 sps:$4 sm:$0xff]   ;;  %v4824_v1 = vld [vmem:[#allocation4 + $0x5e8] ss:$16 sps:$4 sm:$0xff]  }
 0x324   :  { %3105 = vmatpush2.bf16.msra.mxu1 %v4740_v2  ;;  %v4827_v2 = vld [vmem:[#allocation4 + $0x7e8] ss:$16 sps:$4 sm:$0xff]  }
 0x325   :  { %3146 = vmatpush2.bf16.msra.mxu0 %v4743_v3  ;;  %3106 = vmatprep.subr.bf16.mxu1 %v4748_v4  ;;  %v4832_v3 = vld [vmem:[#allocation4 + $0x5cc] ss:$16 sps:$4 sm:$0xff]  }
 0x326   :  { %3147 = vmatprep.subr.bf16.mxu0 %v4751_v5  ;;  %v4835_v4 = vld [vmem:[#allocation4 + $0x7cc] ss:$16 sps:$4 sm:$0xff]   ;;  %v4830_v5 = vld [vmem:[#allocation4 + $0x5c8] ss:$16 sps:$4 sm:$0xff]  }
 0x328   :  { %3107 = vmatpush2.bf16.msra.mxu1 %v4746_v16  ;;  %v4833_v16 = vld [vmem:[#allocation4 + $0x7c8] ss:$16 sps:$4 sm:$0xff]  }
 0x329   :  { %3148 = vmatpush2.bf16.msra.mxu0 %v4749_v6  ;;  %3108 = vmatprep.subr.bf16.mxu1 %v4754_v7  ;;  %v4838_v6 = vld [vmem:[#allocation4 + $0x5ac] ss:$16 sps:$4 sm:$0xff]  }
 0x32a   :  { %3149 = vmatprep.subr.bf16.mxu0 %v4757_v8  ;;  %v4841_v7 = vld [vmem:[#allocation4 + $0x7ac] ss:$16 sps:$4 sm:$0xff]   ;;  %v4836_v8 = vld [vmem:[#allocation4 + $0x5a8] ss:$16 sps:$4 sm:$0xff]  }
 0x32c   :  { %3109 = vmatpush2.bf16.msra.mxu1 %v4752_v9  ;;  %v4839_v9 = vld [vmem:[#allocation4 + $0x7a8] ss:$16 sps:$4 sm:$0xff]  }
 0x32d   :  { %3150 = vmatpush2.bf16.msra.mxu0 %v4755_v10  ;;  %3110 = vmatprep.subr.bf16.mxu1 %v4760_v11  ;;  %v4844_v10 = vld [vmem:[#allocation4 + $0x58c] ss:$16 sps:$4 sm:$0xff]  }
 0x32e   :  { %3151 = vmatprep.subr.bf16.mxu0 %v4763_v13  ;;  %v4847_v11 = vld [vmem:[#allocation4 + $0x78c] ss:$16 sps:$4 sm:$0xff]   ;;  %v4842_v13 = vld [vmem:[#allocation4 + $0x588] ss:$16 sps:$4 sm:$0xff]  }
 0x330   :  { %3111 = vmatpush2.bf16.msra.mxu1 %v4758_v14  ;;  %v4845_v14 = vld [vmem:[#allocation4 + $0x788] ss:$16 sps:$4 sm:$0xff]  }
 0x331   :  { %3152 = vmatpush2.bf16.msra.mxu0 %v4761_v20  ;;  %3112 = vmatprep.subr.bf16.mxu1 %v4766_v23  ;;  %v4850_v20 = vld [vmem:[#allocation4 + $0x56c] ss:$16 sps:$4 sm:$0xff]  }
 0x332   :  { %3153 = vmatprep.subr.bf16.mxu0 %v4769_v12  ;;  %v4853_v23 = vld [vmem:[#allocation4 + $0x76c] ss:$16 sps:$4 sm:$0xff]   ;;  %v4848_v12 = vld [vmem:[#allocation4 + $0x568] ss:$16 sps:$4 sm:$0xff]  }
 0x334   :  { %3113 = vmatpush2.bf16.msra.mxu1 %v4764_v24  ;;  %v4851_v24 = vld [vmem:[#allocation4 + $0x768] ss:$16 sps:$4 sm:$0xff]  }
 0x335   :  { %3154 = vmatpush2.bf16.msra.mxu0 %v4767_v25  ;;  %3114 = vmatprep.subr.bf16.mxu1 %v4772_v26  ;;  %v4856_v25 = vld [vmem:[#allocation4 + $0x54c] ss:$16 sps:$4 sm:$0xff]  }
 0x336   :  { %3155 = vmatprep.subr.bf16.mxu0 %v4775_v27  ;;  %v4859_v26 = vld [vmem:[#allocation4 + $0x74c] ss:$16 sps:$4 sm:$0xff]   ;;  %v4854_v27 = vld [vmem:[#allocation4 + $0x548] ss:$16 sps:$4 sm:$0xff]  }
 0x338   :  { %3115 = vmatpush2.bf16.msra.mxu1 %v4770_v28  ;;  %v4857_v28 = vld [vmem:[#allocation4 + $0x748] ss:$16 sps:$4 sm:$0xff]  }
 0x339   :  { %3156 = vmatpush2.bf16.msra.mxu0 %v4773_v29  ;;  %3166 = vmatprep.subr.bf16.mxu1 %v4778_v30  ;;  %v4862_v29 = vld [vmem:[#allocation4 + $0x52c] ss:$16 sps:$4 sm:$0xff]  }
 0x33a   :  { %3207 = vmatprep.subr.bf16.mxu0 %v4781_v31  ;;  %v4865_v30 = vld [vmem:[#allocation4 + $0x72c] ss:$16 sps:$4 sm:$0xff]   ;;  %v4860_v31 = vld [vmem:[#allocation4 + $0x528] ss:$16 sps:$4 sm:$0xff]  }
 0x33b   :  { %3117 = vmatmul.mubr.bf16.vlgmr.msra.gmra.mxu1 %v5598_v42  ;;  %v4791_v42 = vld [vmem:[#allocation4 + $0x6a8] ss:$16 sps:$4 sm:$0xff]  }
 0x33c   :  { %3158 = vmatmul.mubr.bf16.vlgmr.msra.gmra.mxu0 %v5600_v43  ;;  %3167 = vmatpush1.bf16.msra.mxu1 %v4776_v32  ;;  %v4799_v43 = vld [vmem:[#allocation4 + $0x68c] ss:$16 sps:$4 sm:$0xff]   ;;  %v4863_v32 = vld [vmem:[#allocation4 + $0x728] ss:$16 sps:$4 sm:$0xff]  }
 0x33d   :  { %3198 = vmatprep.mubr.bf16.mxu1 %v5614_v15  ;;  %3208 = vmatpush1.bf16.msra.mxu0 %v4779_v33  ;;  %v4797_v15 = vld [vmem:[#allocation4 + $0x688] ss:$16 sps:$4 sm:$0xff]   ;;  %v4868_v33 = vld [vmem:[#allocation4 + $0x50c] ss:$16 sps:$4 sm:$0xff]  }
 0x33e   :  { %3239 = vmatprep.mubr.bf16.mxu0 %v5616_v19  ;;  %3168 = vmatprep.subr.bf16.mxu1 %v4784_v38  ;;  %v4800_v19 = vld [vmem:[#allocation4 + $0x468] ss:$16 sps:$4 sm:$0xff]   ;;  %v4871_v38 = vld [vmem:[#allocation4 + $0x70c] ss:$16 sps:$4 sm:$0xff]  }
 0x33f   :  { %3209 = vmatprep.subr.bf16.mxu0 %v4787_v34  ;;  %v4866_v34 = vld [vmem:[#allocation4 + $0x508] ss:$16 sps:$4 sm:$0xff]  }
 0x340   :  { %3169 = vmatpush1.bf16.msra.mxu1 %v4782_v39  ;;  %v4869_v39 = vld [vmem:[#allocation4 + $0x708] ss:$16 sps:$4 sm:$0xff]  }
 0x341   :  { %3210 = vmatpush1.bf16.msra.mxu0 %v4785_v35  ;;  %3170 = vmatprep.subr.bf16.mxu1 %v4790_v36  ;;  %v4874_v35 = vld [vmem:[%s5908_s5 + $0x74] ss:$8 sps:$4 sm:$0xff]   ;;  %v4872_v36 = vld [vmem:[%s5908_s5 + $0x70] ss:$8 sps:$4 sm:$0xff]  }
 0x342   :  { %3211 = vmatprep.subr.bf16.mxu0 %v4793_v37  ;;  %v4877_v37 = vld [vmem:[%s5908_s5 + $0x64] ss:$8 sps:$4 sm:$0xff]  }
 0x344   :  { %3171 = vmatpush1.bf16.msra.mxu1 %v4788_v40 }
 0x345   :  { %3212 = vmatpush1.bf16.msra.mxu0 %v4791_v42  ;;  %3172 = vmatprep.subr.bf16.mxu1 %v4796_v41  ;;  %v4875_v41 = vld [vmem:[%s5908_s5 + $0x60] ss:$8 sps:$4 sm:$0xff]  }
 0x346   :  { %3213 = vmatprep.subr.bf16.mxu0 %v4799_v43 }
 0x348   :  { %3173 = vmatpush1.bf16.msra.mxu1 %v4794_v44 }
 0x349   :  { %3214 = vmatpush1.bf16.msra.mxu0 %v4797_v15  ;;  %3174 = vmatprep.subr.bf16.mxu1 %v4802_v45 }
 0x34a   :  { %3215 = vmatprep.subr.bf16.mxu0 %v4805_v48 }
 0x34c   :  { %3175 = vmatpush1.bf16.msra.mxu1 %v4800_v19 }
 0x34d   :  { %3216 = vmatpush1.bf16.msra.mxu0 %v4803_v50  ;;  %3176 = vmatprep.subr.bf16.mxu1 %v4808_v51  ;;  %v4883_v50 = vld [vmem:[%s5908_s5 + $0x44] ss:$8 sps:$4 sm:$0xff]   ;;  %v4920_v51 = vld [vmem:[%s5908_s5 + $0x170] ss:$8 sps:$4 sm:$0xff]  }
 0x34e   :  { %3217 = vmatprep.subr.bf16.mxu0 %v4811_v52  ;;  %v4922_v52 = vld [vmem:[%s5908_s5 + $0x174] ss:$8 sps:$4 sm:$0xff]  }
 0x350   :  { %3177 = vmatpush1.bf16.msra.mxu1 %v4806_v53  ;;  %v4925_v53 = vld [vmem:[%s5908_s5 + $0x164] ss:$8 sps:$4 sm:$0xff]  }
 0x351   :  { %3218 = vmatpush1.bf16.msra.mxu0 %v4809_v54  ;;  %3178 = vmatprep.subr.bf16.mxu1 %v4814_v55  ;;  %v4881_v54 = vld [vmem:[%s5908_s5 + $0x40] ss:$8 sps:$4 sm:$0xff]   ;;  %v4886_v55 = vld [vmem:[%s5908_s5 + $0x34] ss:$8 sps:$4 sm:$0xff]  }
 0x352   :  { %3219 = vmatprep.subr.bf16.mxu0 %v4817_v56  ;;  %v4923_v56 = vld [vmem:[%s5908_s5 + $0x160] ss:$8 sps:$4 sm:$0xff]  }
 0x354   :  { %3179 = vmatpush1.bf16.msra.mxu1 %v4812_v57  ;;  %v4928_v57 = vld [vmem:[%s5908_s5 + $0x154] ss:$8 sps:$4 sm:$0xff]  }
 0x355   :  { %3220 = vmatpush1.bf16.msra.mxu0 %v4815_v58  ;;  %3180 = vmatprep.subr.bf16.mxu1 %v4820_v59  ;;  %v4884_v58 = vld [vmem:[%s5908_s5 + $0x30] ss:$8 sps:$4 sm:$0xff]   ;;  %v4889_v59 = vld [vmem:[%s5908_s5 + $0x24] ss:$8 sps:$4 sm:$0xff]  }
 0x356   :  { %3221 = vmatprep.subr.bf16.mxu0 %v4823_v60  ;;  %v4926_v60 = vld [vmem:[%s5908_s5 + $0x150] ss:$8 sps:$4 sm:$0xff]  }
 0x358   :  { %3181 = vmatpush1.bf16.msra.mxu1 %v4818_v61  ;;  %v4931_v61 = vld [vmem:[%s5908_s5 + $0x144] ss:$8 sps:$4 sm:$0xff]  }
 0x359   :  { %3222 = vmatpush1.bf16.msra.mxu0 %v4821_v62  ;;  %3182 = vmatprep.subr.bf16.mxu1 %v4826_v63  ;;  %v4887_v62 = vld [vmem:[%s5908_s5 + $0x20] ss:$8 sps:$4 sm:$0xff]   ;;  %v4892_v63 = vld [vmem:[%s5908_s5 + $0x14] ss:$8 sps:$4 sm:$0xff]  }
 0x35a   :  { %3223 = vmatprep.subr.bf16.mxu0 %v4829_v0  ;;  %v4929_v0 = vld [vmem:[%s5908_s5 + $0x140] ss:$8 sps:$4 sm:$0xff]  }
 0x35c   :  { %3183 = vmatpush2.bf16.msra.mxu1 %v4824_v1  ;;  %v4934_v1 = vld [vmem:[%s5908_s5 + $0x134] ss:$8 sps:$4 sm:$0xff]  }
 0x35d   :  { %3224 = vmatpush2.bf16.msra.mxu0 %v4827_v2  ;;  %3184 = vmatprep.subr.bf16.mxu1 %v4832_v3  ;;  %v4890_v2 = vld [vmem:[%s5908_s5 + $0x10] ss:$8 sps:$4 sm:$0xff]   ;;  %v4895_v3 = vld [vmem:[%s5908_s5 + $0x4] ss:$8 sps:$4 sm:$0xff]  }
 0x35e   :  { %3225 = vmatprep.subr.bf16.mxu0 %v4835_v4  ;;  %v4932_v4 = vld [vmem:[%s5908_s5 + $0x130] ss:$8 sps:$4 sm:$0xff]  }
 0x360   :  { %3185 = vmatpush2.bf16.msra.mxu1 %v4830_v5  ;;  %v4937_v5 = vld [vmem:[%s5908_s5 + $0x124] ss:$8 sps:$4 sm:$0xff]  }
 0x361   :  { %3226 = vmatpush2.bf16.msra.mxu0 %v4833_v16  ;;  %3186 = vmatprep.subr.bf16.mxu1 %v4838_v6  ;;  %v4893_v16 = vld [vmem:[%s5908_s5] ss:$8 sps:$4 sm:$0xff]   ;;  %v4898_v6 = vld [vmem:[%s5908_s5 + $0xf4] ss:$8 sps:$4 sm:$0xff]  }
 0x362   :  { %3227 = vmatprep.subr.bf16.mxu0 %v4841_v7  ;;  %v4935_v7 = vld [vmem:[%s5908_s5 + $0x120] ss:$8 sps:$4 sm:$0xff]  }
 0x364   :  { %3187 = vmatpush2.bf16.msra.mxu1 %v4836_v8  ;;  %v4940_v8 = vld [vmem:[%s5908_s5 + $0x114] ss:$8 sps:$4 sm:$0xff]  }
 0x365   :  { %3228 = vmatpush2.bf16.msra.mxu0 %v4839_v9  ;;  %3188 = vmatprep.subr.bf16.mxu1 %v4844_v10  ;;  %v4896_v9 = vld [vmem:[%s5908_s5 + $0xf0] ss:$8 sps:$4 sm:$0xff]   ;;  %v4901_v10 = vld [vmem:[%s5908_s5 + $0xe4] ss:$8 sps:$4 sm:$0xff]  }
 0x366   :  { %3229 = vmatprep.subr.bf16.mxu0 %v4847_v11  ;;  %v4938_v11 = vld [vmem:[%s5908_s5 + $0x110] ss:$8 sps:$4 sm:$0xff]  }
 0x368   :  { %3189 = vmatpush2.bf16.msra.mxu1 %v4842_v13  ;;  %v4943_v13 = vld [vmem:[%s5908_s5 + $0x104] ss:$8 sps:$4 sm:$0xff]  }
 0x369   :  { %3230 = vmatpush2.bf16.msra.mxu0 %v4845_v14  ;;  %3190 = vmatprep.subr.bf16.mxu1 %v4850_v20  ;;  %v4899_v14 = vld [vmem:[%s5908_s5 + $0xe0] ss:$8 sps:$4 sm:$0xff]   ;;  %v4904_v20 = vld [vmem:[%s5908_s5 + $0xd4] ss:$8 sps:$4 sm:$0xff]  }
 0x36a   :  { %3231 = vmatprep.subr.bf16.mxu0 %v4853_v23  ;;  %v4941_v23 = vld [vmem:[%s5908_s5 + $0x100] ss:$8 sps:$4 sm:$0xff]  }
 0x36c   :  { %3191 = vmatpush2.bf16.msra.mxu1 %v4848_v12  ;;  %v4946_v12 = vld [vmem:[%s5908_s5 + $0x1f4] ss:$8 sps:$4 sm:$0xff]  }
 0x36d   :  { %3232 = vmatpush2.bf16.msra.mxu0 %v4851_v24  ;;  %3192 = vmatprep.subr.bf16.mxu1 %v4856_v25  ;;  %v4902_v24 = vld [vmem:[%s5908_s5 + $0xd0] ss:$8 sps:$4 sm:$0xff]   ;;  %v4907_v25 = vld [vmem:[%s5908_s5 + $0xc4] ss:$8 sps:$4 sm:$0xff]  }
 0x36e   :  { %3233 = vmatprep.subr.bf16.mxu0 %v4859_v26  ;;  %v4944_v26 = vld [vmem:[%s5908_s5 + $0x1f0] ss:$8 sps:$4 sm:$0xff]  }
 0x370   :  { %3193 = vmatpush2.bf16.msra.mxu1 %v4854_v27  ;;  %v4949_v27 = vld [vmem:[%s5908_s5 + $0x1e4] ss:$8 sps:$4 sm:$0xff]  }
 0x371   :  { %3234 = vmatpush2.bf16.msra.mxu0 %v4857_v28  ;;  %3194 = vmatprep.subr.bf16.mxu1 %v4862_v29  ;;  %v4905_v28 = vld [vmem:[%s5908_s5 + $0xc0] ss:$8 sps:$4 sm:$0xff]   ;;  %v4910_v29 = vld [vmem:[%s5908_s5 + $0xb4] ss:$8 sps:$4 sm:$0xff]  }
 0x372   :  { %3235 = vmatprep.subr.bf16.mxu0 %v4865_v30  ;;  %v4947_v30 = vld [vmem:[%s5908_s5 + $0x1e0] ss:$8 sps:$4 sm:$0xff]  }
 0x374   :  { %3195 = vmatpush2.bf16.msra.mxu1 %v4860_v31  ;;  %v4952_v31 = vld [vmem:[%s5908_s5 + $0x1d4] ss:$8 sps:$4 sm:$0xff]  }
 0x375   :  { %3236 = vmatpush2.bf16.msra.mxu0 %v4863_v32  ;;  %3196 = vmatprep.subr.bf16.mxu1 %v4868_v33  ;;  %v4908_v32 = vld [vmem:[%s5908_s5 + $0xb0] ss:$8 sps:$4 sm:$0xff]   ;;  %v4913_v33 = vld [vmem:[%s5908_s5 + $0xa4] ss:$8 sps:$4 sm:$0xff]  }
 0x376   :  { %3237 = vmatprep.subr.bf16.mxu0 %v4871_v38  ;;  %v4950_v38 = vld [vmem:[%s5908_s5 + $0x1d0] ss:$8 sps:$4 sm:$0xff]  }
 0x378   :  { %3197 = vmatpush2.bf16.msra.mxu1 %v4866_v34  ;;  %v4955_v34 = vld [vmem:[%s5908_s5 + $0x1c4] ss:$8 sps:$4 sm:$0xff]  }
 0x379   :  { %3238 = vmatpush2.bf16.msra.mxu0 %v4869_v39  ;;  %3653 = vmatprep.subr.bf16.mxu1 %v4874_v35  ;;  %v4911_v39 = vld [vmem:[%s5908_s5 + $0xa0] ss:$8 sps:$4 sm:$0xff]   ;;  %v4916_v35 = vld [vmem:[%s5908_s5 + $0x94] ss:$8 sps:$4 sm:$0xff]  }
 0x37a   :  { %3694 = vmatprep.subr.bf16.mxu0 %v4922_v52 }
 0x37b   :  { %3199 = vmatmul.mubr.bf16.vlgmr.msra.gmra.mxu1 %v5618_v21  ;;  %v5642_v40 = vpop.f32.mrf.mxu1  ;;  %v5644_v42 = vpop.f32.mrf.mxu0  ;;  %v4880_v21 = vld [vmem:[%s5908_s5 + $0x54] ss:$8 sps:$4 sm:$0xff]  }
 0x37c   :  { %3240 = vmatmul.mubr.bf16.vlgmr.msra.gmra.mxu0 %v5620_v22  ;;  %3654 = vmatpush1.bf16.msra.mxu1 %v4872_v36  ;;  %v4878_v22 = vld [vmem:[%s5908_s5 + $0x50] ss:$8 sps:$4 sm:$0xff]   ;;  %v4953_v36 = vld [vmem:[%s5908_s5 + $0x1c0] ss:$8 sps:$4 sm:$0xff]  }
 0x37d   :  { %v5650_v43 = vpop.f32.mrf.mxu1  ;;  %v5652_v44 = vpop.f32.mrf.mxu0  ;;  %3655 = vmatprep.subr.bf16.mxu1 %v4877_v37  ;;  %3695 = vmatpush1.bf16.msra.mxu0 %v4920_v51  ;;  %v4958_v37 = vld [vmem:[%s5908_s5 + $0x1b4] ss:$8 sps:$4 sm:$0xff]  }
 0x37e   :  { %3696 = vmatprep.subr.bf16.mxu0 %v4925_v53 }
 0x37f   :  { %v2958_v15 = vpop.f32.mrf.mxu1  ;;  %v2999_v45 = vpop.f32.mrf.mxu0 }
 0x380   :  { %3656 = vmatpush1.bf16.msra.mxu1 %v4875_v41  ;;  %v5804_v41 = vld [vmem:[#allocation6 + $0x3] ss:$8 sm:$0xf]  ;;  %v4919_v15 = vld [vmem:[%s5908_s5 + $0x84] ss:$8 sps:$4 sm:$0xff]  }
 0x381   :  { %v2959_v48 = vpop.f32.mrf.mxu1  ;;  %v3000_v19 = vpop.f32.mrf.mxu0  ;;  %3657 = vmatprep.subr.bf16.mxu1 %v4880_v21  ;;  %3697 = vmatpush1.bf16.msra.mxu0 %v4923_v56  ;;  %v4914_v21 = vld [vmem:[%s5908_s5 + $0x90] ss:$8 sps:$4 sm:$0xff]  }
 0x382   :  { %3698 = vmatprep.subr.bf16.mxu0 %v4928_v57  ;;  %v4956_v45 = vld [vmem:[%s5908_s5 + $0x1b0] ss:$8 sps:$4 sm:$0xff]   ;;  %v1627_v48 = vrot.slane %v5804_v41, %v5387_v49  ;;  %v4917_v19 = vld [vmem:[%s5908_s5 + $0x80] ss:$8 sps:$4 sm:$0xff]  }
 0x384   :  { %3658 = vmatpush1.bf16.msra.mxu1 %v4878_v22  ;;  %v1623_v22 = vrot.slane %v5804_v41, %v5384_v47  ;;  %v2957_v51 = vadd.f32 %v5650_v43, %v1627_v48 }
 0x385   :  { %3659 = vmatprep.subr.bf16.mxu1 %v4883_v50  ;;  %3699 = vmatpush1.bf16.msra.mxu0 %v4926_v60 }
 0x386   :  { %3700 = vmatprep.subr.bf16.mxu0 %v4931_v61  ;;  %v2955_v50 = vadd.f32 %v5642_v40, %v1623_v22  ;;  %v2998_v56 = vadd.f32 %v5652_v44, %v2957_v51  ;;  %v4962_v44 = vld [vmem:[%s5908_s5 + $0x190] ss:$8 sps:$4 sm:$0xff]  }
 0x388   :  { %3660 = vmatpush1.bf16.msra.mxu1 %v4881_v54  ;;  %v2996_v52 = vadd.f32 %v5644_v42, %v2955_v50 }
 0x389   :  { %3661 = vmatprep.subr.bf16.mxu1 %v4886_v55  ;;  %3701 = vmatpush1.bf16.msra.mxu0 %v4929_v0  ;;  %v4961_v55 = vld [vmem:[%s5908_s5 + $0x1a4] ss:$8 sps:$4 sm:$0xff]  }
 0x38a   :  { %3702 = vmatprep.subr.bf16.mxu0 %v4934_v1 }
 0x38c   :  { %3662 = vmatpush1.bf16.msra.mxu1 %v4884_v58  ;;  %v4959_v58 = vld [vmem:[%s5908_s5 + $0x1a0] ss:$8 sps:$4 sm:$0xff]  }
 0x38d   :  { %3663 = vmatprep.subr.bf16.mxu1 %v4889_v59  ;;  %3703 = vmatpush1.bf16.msra.mxu0 %v4932_v4  ;;  %v4967_v4 = vld [vmem:[%s5908_s5 + $0x184] ss:$8 sps:$4 sm:$0xff]  }
 0x38e   :  { %3704 = vmatprep.subr.bf16.mxu0 %v4937_v5 }
 0x390   :  { %3664 = vmatpush1.bf16.msra.mxu1 %v4887_v62  ;;  %v4964_v62 = vld [vmem:[%s5908_s5 + $0x194] ss:$8 sps:$4 sm:$0xff]  }
 0x391   :  { %3665 = vmatprep.subr.bf16.mxu1 %v4892_v63  ;;  %3705 = vmatpush1.bf16.msra.mxu0 %v4935_v7 }
 0x392   :  { %3706 = vmatprep.subr.bf16.mxu0 %v4940_v8 }
 0x394   :  { %3666 = vmatpush1.bf16.msra.mxu1 %v4890_v2 }
 0x395   :  { %3667 = vmatprep.subr.bf16.mxu1 %v4895_v3  ;;  %3707 = vmatpush1.bf16.msra.mxu0 %v4938_v11 }
 0x396   :  { %3708 = vmatprep.subr.bf16.mxu0 %v4943_v13 }
 0x398   :  { %3668 = vmatpush1.bf16.msra.mxu1 %v4893_v16  ;;  %v4965_v16 = vld [vmem:[%s5908_s5 + $0x180] ss:$8 sps:$4 sm:$0xff]  }
 0x399   :  { %3669 = vmatprep.subr.bf16.mxu1 %v4898_v6  ;;  %3709 = vmatpush1.bf16.msra.mxu0 %v4941_v23  ;;  %v4968_v23 = vld [vmem:[%s5909_s6 + $0x78] sm:$0xff]  }
 0x39a   :  { %3710 = vmatprep.subr.bf16.mxu0 %v4946_v12  ;;  %v4969_v12 = vld [vmem:[%s5909_s6 + $0x38] sm:$0xff]  }
 0x39c   :  { %3670 = vmatpush2.bf16.msra.mxu1 %v4896_v9 }
 0x39d   :  { %3671 = vmatprep.subr.bf16.mxu1 %v4901_v10  ;;  %3711 = vmatpush2.bf16.msra.mxu0 %v4944_v26  ;;  %v4972_v26 = vld [vmem:[%s5909_s6 + $0x68] sm:$0xff]  }
 0x39e   :  { %3712 = vmatprep.subr.bf16.mxu0 %v4949_v27  ;;  %v4973_v27 = vld [vmem:[%s5909_s6 + $0x28] sm:$0xff]  }
 0x3a0   :  { %3672 = vmatpush2.bf16.msra.mxu1 %v4899_v14 }
 0x3a1   :  { %3673 = vmatprep.subr.bf16.mxu1 %v4904_v20  ;;  %3713 = vmatpush2.bf16.msra.mxu0 %v4947_v30  ;;  %v4976_v30 = vld [vmem:[%s5909_s6 + $0x58] sm:$0xff]  }
 0x3a2   :  { %3714 = vmatprep.subr.bf16.mxu0 %v4952_v31  ;;  %v4977_v31 = vld [vmem:[%s5909_s6 + $0x18] sm:$0xff]  }
 0x3a4   :  { %3674 = vmatpush2.bf16.msra.mxu1 %v4902_v24  ;;  %v4970_v24 = vld [vmem:[%s5909_s6 + $0x70] sm:$0xff]  }
 0x3a5   :  { %3675 = vmatprep.subr.bf16.mxu1 %v4907_v25  ;;  %3715 = vmatpush2.bf16.msra.mxu0 %v4950_v38  ;;  %v4971_v25 = vld [vmem:[%s5909_s6 + $0x30] sm:$0xff]   ;;  %v1631_v38 = vrot.slane %v5804_v41, %v511_v17 }
 0x3a6   :  { %3716 = vmatprep.subr.bf16.mxu0 %v4955_v34  ;;  %v1635_v34 = vrot.slane %v5804_v41, %v515_v18 }
 0x3a8   :  { %3676 = vmatpush2.bf16.msra.mxu1 %v4905_v28  ;;  %v4974_v28 = vld [vmem:[%s5909_s6 + $0x60] sm:$0xff]  }
 0x3a9   :  { %3677 = vmatprep.subr.bf16.mxu1 %v4910_v29  ;;  %3717 = vmatpush2.bf16.msra.mxu0 %v4953_v36  ;;  %v4975_v29 = vld [vmem:[%s5909_s6 + $0x20] sm:$0xff]  }
 0x3aa   :  { %3718 = vmatprep.subr.bf16.mxu0 %v4958_v37 }
 0x3ac   :  { %3678 = vmatpush2.bf16.msra.mxu1 %v4908_v32  ;;  %v4978_v32 = vld [vmem:[%s5909_s6 + $0x50] sm:$0xff]  }
 0x3ad   :  { %3679 = vmatprep.subr.bf16.mxu1 %v4913_v33  ;;  %3719 = vmatpush2.bf16.msra.mxu0 %v4956_v45  ;;  %v4979_v33 = vld [vmem:[%s5909_s6 + $0x10] sm:$0xff]  }
 0x3ae   :  { %3720 = vmatprep.subr.bf16.mxu0 %v4961_v55 }
 0x3b0   :  { %3680 = vmatpush2.bf16.msra.mxu1 %v4911_v39 }
 0x3b1   :  { %3681 = vmatprep.subr.bf16.mxu1 %v4916_v35  ;;  %3721 = vmatpush2.bf16.msra.mxu0 %v4959_v58  ;;  %v4980_v58 = vld [vmem:[%s5909_s6 + $0x48] sm:$0xff]  }
 0x3b2   :  { %3722 = vmatprep.subr.bf16.mxu0 %v4964_v62 }
 0x3b4   :  { %3682 = vmatpush2.bf16.msra.mxu1 %v4914_v21 }
 0x3b5   :  { %3683 = vmatprep.subr.bf16.mxu1 %v4919_v15  ;;  %3723 = vmatpush2.bf16.msra.mxu0 %v4962_v44 }
 0x3b6   :  { %3724 = vmatprep.subr.bf16.mxu0 %v4967_v4 }
 0x3b8   :  { %3684 = vmatpush2.bf16.msra.mxu1 %v4917_v19 }
 0x3b9   :  { %3725 = vmatpush2.bf16.msra.mxu0 %v4965_v16  ;;  %4428 = vmatprep.subr.bf16.mxu1 %v4968_v23 }
 0x3bb   :  { %v3036_v53 = vpop.f32.mrf.mxu1  ;;  %v3077_v54 = vpop.f32.mrf.mxu0 }
 0x3bc   :  { %v3037_v57 = vadd.f32 %v3036_v53, %v2996_v52 }
 0x3bd   :  { %v3038_v59 = vpop.f32.mrf.mxu1  ;;  %v3079_v40 = vpop.f32.mrf.mxu0 }
 0x3be   :  { %v3078_v43 = vadd.f32 %v3077_v54, %v3037_v57  ;;  %v3039_v60 = vadd.f32 %v3038_v59, %v2998_v56  ;;  %v4981_v59 = vld [vmem:[%s5909_s6 + $0x8] sm:$0xff]  }
 0x3bf   :  { %v3040_v42 = vpop.f32.mrf.mxu1  ;;  %v3081_v61 = vpop.f32.mrf.mxu0 }
 0x3c0   :  { %v3080_v63 = vadd.f32 %v3079_v40, %v3039_v60  ;;  %v3248_v0 = vmax.f32 %v3078_v43, 0.0  ;;  %v4982_v60 = vld [vmem:[%s5909_s6 + $0x40] sm:$0xff]  }
 0x3c1   :  { %v3041_v1 = vpop.f32.mrf.mxu1  ;;  %v3082_v2 = vpop.f32.mrf.mxu0  ;;  %v4983_v42 = vld [vmem:[%s5909_s6] sm:$0xff]  }
 0x3c2   :  { %v3249_v3 = vmax.f32 %v3080_v63, 0.0  ;;  %v3252_v6 = vpack.c.bf16 %v3248_v0, %v3248_v0  ;;  %v3321_v61 = vld [vmem:[#allocation6 + $0x4] ss:$8 sm:$0x3] }
 0x3c3   :  { %v3326_v62 = vrot.slane %v3321_v61, %v5384_v47  ;;  %v3330_v63 = vrot.slane %v3321_v61, %v5387_v49 }
 0x3c4   :  { %v3253_v5 = vpack.c.bf16 %v3249_v3, %v3249_v3 }
 0x3c6   :  { %3685 = vmatprep.mubr.bf16.mxu1 %v3253_v5 }
 0x3c7   :  { %3686 = vmatmul.mubr.bf16.vlgmr.msra.gmra.mxu1 %v3252_v6 }
 0x3c8   :  { %4429 = vmatpush3.bf16.msra.mxu1 %v4969_v12 }
 0x3c9   :  { %4430 = vmatprep.subr.bf16.mxu1 %v4970_v24 }
 0x3cc   :  { %4431 = vmatpush3.bf16.msra.mxu1 %v4971_v25 }
 0x3cd   :  { %4432 = vmatprep.subr.bf16.mxu1 %v4972_v26 }
 0x3d0   :  { %4433 = vmatpush3.bf16.msra.mxu1 %v4973_v27 }
 0x3d1   :  { %4434 = vmatprep.subr.bf16.mxu1 %v4974_v28 }
 0x3d4   :  { %4435 = vmatpush3.bf16.msra.mxu1 %v4975_v29 }
 0x3d5   :  { %4436 = vmatprep.subr.bf16.mxu1 %v4976_v30 }
 0x3d8   :  { %4437 = vmatpush3.bf16.msra.mxu1 %v4977_v31 }
 0x3d9   :  { %4438 = vmatprep.subr.bf16.mxu1 %v4978_v32 }
 0x3dc   :  { %4439 = vmatpush3.bf16.msra.mxu1 %v4979_v33 }
 0x3dd   :  { %4440 = vmatprep.subr.bf16.mxu1 %v4980_v58 }
 0x3e0   :  { %4441 = vmatpush3.bf16.msra.mxu1 %v4981_v59 }
 0x3e1   :  { %4442 = vmatprep.subr.bf16.mxu1 %v4982_v60 }
 0x3e4   :  { %4443 = vmatpush3.bf16.msra.mxu1 %v4983_v42 }
 0x3fb   :  { %v3118_v7 = vpop.f32.mrf.mxu1 }
 0x3fc   :  { %v3159_v8 = vpop.f32.mrf.mxu0  ;;  %v3119_v39 = vadd.f32 %v3118_v7, %v1631_v38 }
 0x3fd   :  { %v3120_v9 = vpop.f32.mrf.mxu1 }
 0x3fe   :  { %v3161_v10 = vpop.f32.mrf.mxu0  ;;  %v3121_v35 = vadd.f32 %v3120_v9, %v1635_v34  ;;  %v3160_v36 = vadd.f32 %v3159_v8, %v3119_v39 }
 0x3ff   :  { %v3122_v11 = vpop.f32.mrf.mxu1 }
 0x400   :  { %v3163_v13 = vpop.f32.mrf.mxu0  ;;  %v3162_v21 = vadd.f32 %v3161_v10, %v3121_v35  ;;  %v3771_v11 = vld [vmem:[#allocation6 + $0x5] ss:$0 sm:$0xff] }
 0x401   :  { %v3123_v14 = vpop.f32.mrf.mxu1 }
 0x402   :  { %v3164_v20 = vpop.f32.mrf.mxu0 }
 0x43b   :  { %v3200_v37 = vpop.f32.mrf.mxu1 }
 0x43c   :  { %v3201_v15 = vadd.f32 %v3200_v37, %v3160_v36  ;;  %v3241_v45 = vpop.f32.mrf.mxu0 }
 0x43d   :  { %v3202_v22 = vpop.f32.mrf.mxu1 }
 0x43e   :  { %v3242_v48 = vadd.f32 %v3241_v45, %v3201_v15  ;;  %v3203_v19 = vadd.f32 %v3202_v22, %v3162_v21  ;;  %v3243_v50 = vpop.f32.mrf.mxu0 }
 0x43f   :  { %v3204_v51 = vpop.f32.mrf.mxu1 }
 0x440   :  { %v3244_v52 = vadd.f32 %v3243_v50, %v3203_v19  ;;  %v3245_v53 = vpop.f32.mrf.mxu0  ;;  %v3250_v54 = vmax.f32 %v3242_v48, 0.0 }
 0x441   :  { %v3205_v17 = vpop.f32.mrf.mxu1 }
 0x442   :  { %v3251_v55 = vmax.f32 %v3244_v52, 0.0  ;;  %v3246_v46 = vpop.f32.mrf.mxu0  ;;  %v3254_v18 = vpack.c.bf16 %v3250_v54, %v3250_v54 }
 0x444   :  { %v3255_v56 = vpack.c.bf16 %v3251_v55, %v3251_v55 }
 0x446   :  { %3726 = vmatprep.mubr.bf16.mxu0 %v3255_v56 }
 0x447   :  { %3727 = vmatmul.mubr.bf16.vlgmr.msra.gmra.mxu0 %v3254_v18 }
 0x487   :  { %v3687_v41 = vpop.f32.mrf.mxu1 }
 0x488   :  { %v3688_v44 = vadd.f32 %v3687_v41, %v3326_v62 }
 0x489   :  { %v3689_v57 = vpop.f32.mrf.mxu1 }
 0x48a   :  { %v3690_v1 = vadd.f32 %v3689_v57, %v3330_v63 }
 0x48b   :  { %v3691_v40 = vpop.f32.mrf.mxu1 }
 0x48d   :  { %v3692_v43 = vpop.f32.mrf.mxu1 }
 0x507   :  { %v3728_v0 = vpop.f32.mrf.mxu0 }
 0x508   :  { %v3729_v2 = vadd.f32 %v3728_v0, %v3688_v44 }
 0x509   :  { %v3730_v3 = vpop.f32.mrf.mxu0 }
 0x50a   :  { %v3731_v4 = vadd.f32 %v3730_v3, %v3690_v1  ;;  %v3735_v5 = vmax.f32 %v3729_v2, 0.0 }
 0x50b   :  { %v3732_v16 = vpop.f32.mrf.mxu0 }
 0x50c   :  { %v3736_v6 = vmax.f32 %v3731_v4, 0.0  ;;  %v3737_v9 = vpack.c.bf16 %v3735_v5, %v3735_v5 }
 0x50d   :  { %v3733_v7 = vpop.f32.mrf.mxu0 }
 0x50e   :  { %v3738_v8 = vpack.c.bf16 %v3736_v6, %v3736_v6 }
 0x510   :  { %3900 = vmatprep.mubr.bf16.mxu1 %v3738_v8 }
 0x511   :  { %3901 = vmatmul.mubr.bf16.vlgmr.msra.gmra.mxu1 %v3737_v9 }
 0x5d1   :  { %v4444_v10 = vpop.f32.mrf.mxu1 }
 0x5d3   :  { %v4445_v13 = vpop.f32.mrf.mxu1 }
 0x5d4   :  { %v4446_v47 = vadd.f32 %v4445_v13, %v4444_v10 }
 0x5d5   :  { %v4447_v14 = vpop.f32.mrf.mxu1 }
 0x5d6   :  { %v3903_v49 = vadd.f32 %v4446_v47, %v3771_v11 }
 0x5d7   :  { %v4448_v20 = vpop.f32.mrf.mxu1 }
 0x5d8   :  { %3908 = vst [vmem:[%s5911_s8] sm:$0xff] %v3903_v49 }
 0x5d9   :  { %3913 = vsyncpa [#allocation3], 1 }
 0x5da   :  { %3914 = vsyncpa [#allocation5], 1 }

</bundles_post_ra>
